<compile_context>
chip_gen: v7x
topology: tpu7x:2x2x1
jax: 0.10.0
libtpu: 0.0.40
codegen_flags: <defaults>
</compile_context>

<pallas_src>
import functools
import math

import jax
import jax.numpy as jnp
from jax import lax
from jax.experimental import pallas as pl
from jax.experimental.pallas import tpu as pltpu


_F32 = jnp.float32
_COMPILER_PARAMS = pltpu.CompilerParams(dimension_semantics=("parallel",))


# ----------------------------------------------------------------------------
# In-kernel helpers (all operate on (C, lanes) values: channels on sublanes).
# ----------------------------------------------------------------------------
def _pad_value(x, p, mode):
    """Reflect / zero pad a (C, L) value along the lane axis (no scratch ref)."""
    if p == 0:
        return x
    L = x.shape[-1]
    if mode == 'reflect':
        # torch 'reflect': padded[i] = x[p - i]; padded[p + L + i] = x[L - 2 - i]
        left = [x[:, p - i:p - i + 1] for i in range(p)]
        right = [x[:, L - 2 - i:L - 1 - i] for i in range(p)]
    else:  # zeros
        z = jnp.zeros((x.shape[0], 1), x.dtype)
        left = [z] * p
        right = [z] * p
    return jnp.concatenate(left + [x] + right, axis=-1)


def _conv1d_folded(x_cols, w_ref, b_ref, *, K, C_in, C_out, stride, dilation,
                   padding, pad_mode, NB, L_in, L_out):
    """1-D conv of NB batch-folded signals; one small MXU matmul per tap.

    x_cols : (C_in, NB*L_in) value  (batches concatenated along lanes)
    w_ref  : (K, C_out, C_in) ref   (w_ref[k] = tap-k weight tile)
    b_ref  : (C_out, 1) ref
    returns (C_out, NB*L_out) float32
    """
    bias = jnp.broadcast_to(b_ref[...].astype(_F32), (C_out, L_out))  # hoisted
    outs = []
    for nb in range(NB):                                   # static unroll
        xs = x_cols[:, nb * L_in:(nb + 1) * L_in]          # (C_in, L_in)
        xp = _pad_value(xs, padding, pad_mode)             # (C_in, L_in + 2p)
        acc = bias
        for k in range(K):                                 # static unroll
            start = k * dilation
            if stride == 1:
                tap = xp[:, start:start + L_out]           # contiguous lane slice
            else:
                # TODO(synk): strided lane slice relayouts through the XLU;
                # pre-dephase the input if the stride > 1 path becomes hot.
                tap = lax.slice(xp, (0, start),
                                (C_in, start + (L_out - 1) * stride + 1),
                                (1, stride))
            acc = acc + jnp.dot(w_ref[k], tap.astype(_F32),
                                preferred_element_type=_F32,
                                precision=lax.Precision.HIGHEST)
        outs.append(acc)
    return outs[0] if NB == 1 else jnp.concatenate(outs, axis=-1)


def _emit_stats(st_ref, y):
    """Per-channel (sum, M2) of a (C, lanes) f32 value into a (1, C, 2) block."""
    inv_n = 1.0 / y.shape[-1]
    s = jnp.sum(y, axis=-1, keepdims=True)                 # (C, 1)
    d = y - s * inv_n
    m2 = jnp.sum(d * d, axis=-1, keepdims=True)            # (C, 1)
    st_ref[0] = jnp.concatenate([s, m2], axis=-1)          # one (C, 2) store


# ----------------------------------------------------------------------------
# Stage kernels (grid = (G,), one batch-group of NB signals per step).
# ----------------------------------------------------------------------------
def _stage1_kernel(x_ref, w_ref, b_ref, *out_refs, K, C_in, C_out, stride,
                   dilation, padding, pad_mode, NB, L_in, L_out, with_skip):
    """conv1 + partial BN1 stats (+ partial skip-BN stats on x)."""
    if with_skip:
        y_ref, st_ref, stx_ref = out_refs
    else:
        y_ref, st_ref = out_refs
    x = x_ref[...]                                          # (C_in, NB*L_in)
    y = _conv1d_folded(x, w_ref, b_ref, K=K, C_in=C_in, C_out=C_out,
                       stride=stride, dilation=dilation, padding=padding,
                       pad_mode=pad_mode, NB=NB, L_in=L_in, L_out=L_out)
    y_ref[...] = y.astype(y_ref.dtype)
    _emit_stats(st_ref, y)
    if with_skip:
        _emit_stats(stx_ref, x.astype(_F32))


def _stage2_kernel(y1_ref, sc1_ref, sh1_ref, w_ref, b_ref, y2_ref, st2_ref, *,
                   K, C_out, dilation, padding, pad_mode, NB, L_in, L_out):
    """fused BN1 scale/shift + ReLU -> conv2 (stride 1) + partial BN2 stats."""
    a = jnp.maximum(y1_ref[...].astype(_F32) * sc1_ref[...] + sh1_ref[...], 0.0)
    y2 = _conv1d_folded(a, w_ref, b_ref, K=K, C_in=C_out, C_out=C_out,
                        stride=1, dilation=dilation, padding=padding,
                        pad_mode=pad_mode, NB=NB, L_in=L_in, L_out=L_out)
    y2_ref[...] = y2.astype(y2_ref.dtype)
    _emit_stats(st2_ref, y2)


def _stage3_kernel(*refs, with_skip, inv_sqrt2):
    """fused BN2 + skip-BN + add + /sqrt(2) + ReLU, one lane-dense store."""
    if with_skip:
        y2_ref, x_ref, sc2_ref, sh2_ref, scs_ref, shs_ref, o_ref = refs
    else:
        y2_ref, sc2_ref, sh2_ref, o_ref = refs
    z = y2_ref[...].astype(_F32) * sc2_ref[...] + sh2_ref[...]
    if with_skip:
        z = z + x_ref[...].astype(_F32) * scs_ref[...] + shs_ref[...]
    o_ref[...] = jnp.maximum(z * inv_sqrt2, 0.0).astype(o_ref.dtype)


# ----------------------------------------------------------------------------
# Wrapper
# ----------------------------------------------------------------------------
def _pick_nb(N, C, lane_sizes, itemsize):
    """Largest batch-group NB (dividing N) with legal, VMEM-friendly tiles."""
    lmax = max(lane_sizes)
    cap = 1 << 20  # ~1 MiB per (C, NB*Lmax) buffer; several double-buffered
                   # tiles stay far below even v7x's 64 MiB/TC VMEM.

    def fits(nb):
        return C * nb * lmax * max(itemsize, 4) <= cap

    if fits(N):
        return N
    for nb in range(N - 1, 0, -1):
        # Block last dim must be a multiple of 128 unless it spans the array.
        if N % nb == 0 and fits(nb) and all((nb * l) % 128 == 0 for l in lane_sizes):
            return nb
    return N  # TODO(synk): add an L-tile grid axis with halo DMA for huge C*L


def _fold_bn(stats, n_per_block, gamma, beta, eps):
    """Combine per-block (sum, M2) into BN scale/shift (exact group variance)."""
    G = stats.shape[0]
    count = G * n_per_block
    s = stats[:, :, 0]                                      # (G, C)
    m2 = stats[:, :, 1]
    mean = jnp.sum(s, axis=0) / count                       # (C,)
    mb = s / n_per_block                                    # per-block means
    var = (jnp.sum(m2, axis=0)
           + n_per_block * jnp.sum((mb - mean[None, :]) ** 2, axis=0)) / count
    var = jnp.maximum(var, 0.0)
    scale = gamma.astype(_F32) * lax.rsqrt(var + eps)
    shift = beta.astype(_F32) - mean * scale
    C = gamma.shape[0]
    return scale.reshape(C, 1), shift.reshape(C, 1)


def skip2_conv_norm_acti_1d(x, w1, b1, g1, be1, w2, b2, g2, be2,
                            g_skip, be_skip, *, stride=1, padding=0,
                            dilation=1, padding_mode='reflect', eps=1e-5):
    """Forward pass of Skip2ConvNormActi_1d.  x: (N, C_in, L), torch NCL layout."""
    N, C_in, L = x.shape
    C_out, C_in_w, K = w1.shape
    assert C_in_w == C_in, "groups != 1 not supported"  # TODO(synk): grouped conv
    assert w2.shape == (C_out, C_out, K)
    pad_mode = 'reflect' if padding_mode == 'reflect' else 'zeros'

    L1 = (L + 2 * padding - dilation * (K - 1) - 1) // stride + 1
    L2 = L1 + 2 * padding - dilation * (K - 1)
    if pad_mode == 'reflect' and padding > 0:
        # torch raises when padding >= input length for reflect padding.
        assert padding <= L - 1 and padding <= L1 - 1, "reflect padding too large"

    with_skip = (C_out == C_in) and (stride == 1)
    if with_skip:
        assert L2 == L, "skip branch requires 'same' conv geometry"

    inter = x.dtype   # intermediates in input dtype; stats/accumulation in f32
    inv_sqrt2 = 1.0 / math.sqrt(2.0)

    # Fold batch onto the lane axis: (N, C, L) -> (C, N*L).  Tiny XLA transpose;
    # buys lane-dense blocks / unmasked stores at small L.
    xt = jnp.transpose(x, (1, 0, 2)).reshape(C_in, N * L)

    # Per-tap weight tiles (K, C_out, C_in): w[k] @ x_slice runs on the MXU.
    w1_t = jnp.transpose(w1, (2, 0, 1)).astype(_F32)
    w2_t = jnp.transpose(w2, (2, 0, 1)).astype(_F32)
    b1_c = (b1 if b1 is not None else jnp.zeros((C_out,), _F32)).reshape(C_out, 1).astype(_F32)
    b2_c = (b2 if b2 is not None else jnp.zeros((C_out,), _F32)).reshape(C_out, 1).astype(_F32)

    NB = _pick_nb(N, max(C_in, C_out), (L, L1, L2), jnp.dtype(inter).itemsize)
    G = N // NB

    full = lambda shape: pl.BlockSpec(shape, lambda g: (0,) * len(shape))
    lane = lambda c, l: pl.BlockSpec((c, NB * l), lambda g: (0, g))
    stat = pl.BlockSpec((1, C_out, 2), lambda g: (g, 0, 0))
    stat_in = pl.BlockSpec((1, C_in, 2), lambda g: (g, 0, 0))

    # ---- stage 1: conv1 + partial BN1 stats (+ skip-BN stats on x) ----------
    out_shapes1 = [jax.ShapeDtypeStruct((C_out, N * L1), inter),
                   jax.ShapeDtypeStruct((G, C_out, 2), _F32)]
    out_specs1 = [lane(C_out, L1), stat]
    if with_skip:
        out_shapes1.append(jax.ShapeDtypeStruct((G, C_in, 2), _F32))
        out_specs1.append(stat_in)

    res1 = pl.pallas_call(
        functools.partial(_stage1_kernel, K=K, C_in=C_in, C_out=C_out,
                          stride=stride, dilation=dilation, padding=padding,
                          pad_mode=pad_mode, NB=NB, L_in=L, L_out=L1,
                          with_skip=with_skip),
        grid=(G,),
        in_specs=[lane(C_in, L), full((K, C_out, C_in)), full((C_out, 1))],
        out_specs=out_specs1,
        out_shape=out_shapes1,
        compiler_params=_COMPILER_PARAMS,
    )(xt, w1_t, b1_c)
    if with_skip:
        y1, st1, stx = res1
    else:
        y1, st1 = res1

    sc1, sh1 = _fold_bn(st1, NB * L1, g1, be1, eps)

    # ---- stage 2: fused BN1+ReLU -> conv2 + partial BN2 stats ---------------
    y2, st2 = pl.pallas_call(
        functools.partial(_stage2_kernel, K=K, C_out=C_out, dilation=dilation,
                          padding=padding, pad_mode=pad_mode, NB=NB,
                          L_in=L1, L_out=L2),
        grid=(G,),
        in_specs=[lane(C_out, L1), full((C_out, 1)), full((C_out, 1)),
                  full((K, C_out, C_out)), full((C_out, 1))],
        out_specs=[lane(C_out, L2), stat],
        out_shape=[jax.ShapeDtypeStruct((C_out, N * L2), inter),
                   jax.ShapeDtypeStruct((G, C_out, 2), _F32)],
        compiler_params=_COMPILER_PARAMS,
    )(y1, sc1, sh1, w2_t, b2_c)

    sc2, sh2 = _fold_bn(st2, NB * L2, g2, be2, eps)

    # ---- stage 3: fused BN2 + skip-BN + add + /sqrt(2) + ReLU ---------------
    # y2 and the output have the same shape/dtype, so alias the buffers.
    aliases = {0: 0} if inter == x.dtype else {}
    if with_skip:
        scs, shs = _fold_bn(stx, NB * L, g_skip, be_skip, eps)
        out2d = pl.pallas_call(
            functools.partial(_stage3_kernel, with_skip=True, inv_sqrt2=inv_sqrt2),
            grid=(G,),
            in_specs=[lane(C_out, L2), lane(C_in, L),
                      full((C_out, 1)), full((C_out, 1)),
                      full((C_out, 1)), full((C_out, 1))],
            out_specs=lane(C_out, L2),
            out_shape=jax.ShapeDtypeStruct((C_out, N * L2), x.dtype),
            input_output_aliases=aliases,
            compiler_params=_COMPILER_PARAMS,
        )(y2, xt, sc2, sh2, scs, shs)
    else:
        out2d = pl.pallas_call(
            functools.partial(_stage3_kernel, with_skip=False, inv_sqrt2=inv_sqrt2),
            grid=(G,),
            in_specs=[lane(C_out, L2), full((C_out, 1)), full((C_out, 1))],
            out_specs=lane(C_out, L2),
            out_shape=jax.ShapeDtypeStruct((C_out, N * L2), x.dtype),
            input_output_aliases=aliases,
            compiler_params=_COMPILER_PARAMS,
        )(y2, sc2, sh2)

    # Unfold lanes back to torch NCL layout.
    return jnp.transpose(out2d.reshape(C_out, N, L2), (1, 0, 2))


# ----------------------------------------------------------------------------
# Pure-JAX reference (torch semantics: reflect pad, training-mode BN).
# ----------------------------------------------------------------------------
def _reference(x, w1, b1, g1, be1, w2, b2, g2, be2, g_skip, be_skip, *,
               stride, padding, dilation, eps):
    def conv_bn(x, w, b, gamma, beta, stride, acti):
        xp = jnp.pad(x, ((0, 0), (0, 0), (padding, padding)), mode='reflect') \
            if padding > 0 else x
        y = lax.conv_general_dilated(
            xp, w, window_strides=(stride,), padding='VALID',
            rhs_dilation=(dilation,), dimension_numbers=('NCH', 'OIH', 'NCH'),
            precision=lax.Precision.HIGHEST)
        y = y + b[None, :, None]
        mean = y.mean(axis=(0, 2), keepdims=True)
        var = ((y - mean) ** 2).mean(axis=(0, 2), keepdims=True)
        y = (y - mean) / jnp.sqrt(var + eps) * gamma[None, :, None] + beta[None, :, None]
        return jnp.maximum(y, 0.0) if acti else y

    y = conv_bn(x, w1, b1, g1, be1, stride, True)
    y = conv_bn(y, w2, b2, g2, be2, 1, False)
    if x.shape[1] == w1.shape[0] and stride == 1:
        mean = x.mean(axis=(0, 2), keepdims=True)
        var = ((x - mean) ** 2).mean(axis=(0, 2), keepdims=True)
        s = (x - mean) / jnp.sqrt(var + eps) * g_skip[None, :, None] + be_skip[None, :, None]
    else:
        s = 0.0
    return jnp.maximum((y + s) / math.sqrt(2.0), 0.0)


if __name__ == "__main__":
    # Skip2ConvNormActi_1d(in_channels=8, out_channels=8, kernel_size=3,
    #                      stride=1, padding=1, dilation=1, groups=1, bias=True,
    #                      padding_mode='reflect')  -> skip BatchNorm branch active.
    N, C, L, K = 2, 8, 16, 3
    STRIDE, PAD, DIL, EPS = 1, 1, 1, 1e-5

    key = jax.random.PRNGKey(0)
    ks = jax.random.split(key, 11)
    x = jax.random.normal(ks[0], (N, C, L), dtype=jnp.float32)
    w1 = jax.random.normal(ks[1], (C, C, K), dtype=jnp.float32) * 0.3
    b1 = jax.random.normal(ks[2], (C,), dtype=jnp.float32) * 0.1
    g1 = 1.0 + 0.1 * jax.random.normal(ks[3], (C,), dtype=jnp.float32)
    be1 = 0.1 * jax.random.normal(ks[4], (C,), dtype=jnp.float32)
    w2 = jax.random.normal(ks[5], (C, C, K), dtype=jnp.float32) * 0.3
    b2 = jax.random.normal(ks[6], (C,), dtype=jnp.float32) * 0.1
    g2 = 1.0 + 0.1 * jax.random.normal(ks[7], (C,), dtype=jnp.float32)
    be2 = 0.1 * jax.random.normal(ks[8], (C,), dtype=jnp.float32)
    gs = 1.0 + 0.1 * jax.random.normal(ks[9], (C,), dtype=jnp.float32)
    bes = 0.1 * jax.random.normal(ks[10], (C,), dtype=jnp.float32)

    fwd = jax.jit(functools.partial(
        skip2_conv_norm_acti_1d, stride=STRIDE, padding=PAD, dilation=DIL,
        padding_mode='reflect', eps=EPS))
    out = jax.block_until_ready(fwd(x, w1, b1, g1, be1, w2, b2, g2, be2, gs, bes))

    ref = jax.block_until_ready(_reference(
        x, w1, b1, g1, be1, w2, b2, g2, be2, gs, bes,
        stride=STRIDE, padding=PAD, dilation=DIL, eps=EPS))

    assert out.shape == (N, C, L), out.shape
    err = float(jnp.max(jnp.abs(out - ref)))
    # Tolerance leaves headroom for MXU f32 multi-pass accumulation order.
    assert jnp.allclose(out, ref, rtol=5e-3, atol=5e-3), err
    print("KERNEL_OK")
</pallas_src>

<mosaic_0001>
module attributes {stable_mosaic.version = 11 : i64} {
  func.func @_stage1_kernel(%arg0: i32, %arg1: memref<8x32xf32, #tpu.memory_space<vmem>>, %arg2: memref<3x8x8xf32, #tpu.memory_space<vmem>>, %arg3: memref<8x1xf32, #tpu.memory_space<vmem>>, %arg4: memref<8x32xf32, #tpu.memory_space<vmem>>, %arg5: memref<1x8x2xf32, #tpu.memory_space<vmem>>, %arg6: memref<1x8x2xf32, #tpu.memory_space<vmem>>) attributes {dimension_semantics = [#tpu.dimension_semantics<parallel>], iteration_bounds = array<i64: 1>, scalar_prefetch = 0 : i64, scratch_operands = 0 : i64, tpu.core_type = #tpu.core_type<tc>, window_params = [{transform_indices = @transform_0, window_bounds = array<i64: 8, 32>}, {pipeline_mode = #tpu.pipeline_mode<synchronous>, transform_indices = @transform_1, window_bounds = array<i64: 3, 8, 8>}, {pipeline_mode = #tpu.pipeline_mode<synchronous>, transform_indices = @transform_2, window_bounds = array<i64: 8, 1>}, {transform_indices = @transform_3, window_bounds = array<i64: 8, 32>}, {transform_indices = @transform_4, window_bounds = array<i64: 1, 8, 2>}, {transform_indices = @transform_5, window_bounds = array<i64: 1, 8, 2>}]} {
    %c0 = arith.constant 0 : index
    %c0_0 = arith.constant 0 : index
    %0 = vector.load %arg1[%c0, %c0_0] : memref<8x32xf32, #tpu.memory_space<vmem>>, vector<8x32xf32>
    %c0_1 = arith.constant 0 : index
    %c0_2 = arith.constant 0 : index
    %1 = vector.load %arg3[%c0_1, %c0_2] : memref<8x1xf32, #tpu.memory_space<vmem>>, vector<8x1xf32>
    %2 = vector.shape_cast %1 : vector<8x1xf32> to vector<8x1xf32>
    %3 = vector.broadcast %2 : vector<8x1xf32> to vector<8x16xf32>
    %4 = vector.extract_strided_slice %0 {offsets = [0, 0], sizes = [8, 16], strides = [1, 1]} : vector<8x32xf32> to vector<8x16xf32>
    %5 = vector.extract_strided_slice %4 {offsets = [0, 1], sizes = [8, 1], strides = [1, 1]} : vector<8x16xf32> to vector<8x1xf32>
    %6 = vector.extract_strided_slice %4 {offsets = [0, 14], sizes = [8, 1], strides = [1, 1]} : vector<8x16xf32> to vector<8x1xf32>
    %7 = tpu.concatenate %5, %4, %6 in 1 : vector<8x1xf32>, vector<8x16xf32>, vector<8x1xf32> -> vector<8x18xf32>
    %8 = vector.extract_strided_slice %7 {offsets = [0, 0], sizes = [8, 16], strides = [1, 1]} : vector<8x18xf32> to vector<8x16xf32>
    %c0_3 = arith.constant 0 : index
    %c0_4 = arith.constant 0 : index
    %c0_5 = arith.constant 0 : index
    %9 = vector.load %arg2[%c0_3, %c0_4, %c0_5] : memref<3x8x8xf32, #tpu.memory_space<vmem>>, vector<1x8x8xf32>
    %10 = vector.shape_cast %9 : vector<1x8x8xf32> to vector<8x8xf32>
    %cst = arith.constant dense<0.000000e+00> : vector<8x16xf32>
    %11 = tpu.matmul %10, %8, %cst {dimension_numbers = #tpu.dot_dimension_numbers<[1], [0], [0], [1], [0, 0, 1, 1], [], []>, precision = #tpu.contract_precision<fp32>} : vector<8x8xf32>, vector<8x16xf32>, vector<8x16xf32> -> vector<8x16xf32>
    %12 = arith.addf %3, %11 : vector<8x16xf32>
    %13 = vector.extract_strided_slice %7 {offsets = [0, 1], sizes = [8, 16], strides = [1, 1]} : vector<8x18xf32> to vector<8x16xf32>
    %c1 = arith.constant 1 : index
    %c0_6 = arith.constant 0 : index
    %c0_7 = arith.constant 0 : index
    %14 = vector.load %arg2[%c1, %c0_6, %c0_7] : memref<3x8x8xf32, #tpu.memory_space<vmem>>, vector<1x8x8xf32>
    %15 = vector.shape_cast %14 : vector<1x8x8xf32> to vector<8x8xf32>
    %cst_8 = arith.constant dense<0.000000e+00> : vector<8x16xf32>
    %16 = tpu.matmul %15, %13, %cst_8 {dimension_numbers = #tpu.dot_dimension_numbers<[1], [0], [0], [1], [0, 0, 1, 1], [], []>, precision = #tpu.contract_precision<fp32>} : vector<8x8xf32>, vector<8x16xf32>, vector<8x16xf32> -> vector<8x16xf32>
    %17 = arith.addf %12, %16 : vector<8x16xf32>
    %18 = vector.extract_strided_slice %7 {offsets = [0, 2], sizes = [8, 16], strides = [1, 1]} : vector<8x18xf32> to vector<8x16xf32>
    %c2 = arith.constant 2 : index
    %c0_9 = arith.constant 0 : index
    %c0_10 = arith.constant 0 : index
    %19 = vector.load %arg2[%c2, %c0_9, %c0_10] : memref<3x8x8xf32, #tpu.memory_space<vmem>>, vector<1x8x8xf32>
    %20 = vector.shape_cast %19 : vector<1x8x8xf32> to vector<8x8xf32>
    %cst_11 = arith.constant dense<0.000000e+00> : vector<8x16xf32>
    %21 = tpu.matmul %20, %18, %cst_11 {dimension_numbers = #tpu.dot_dimension_numbers<[1], [0], [0], [1], [0, 0, 1, 1], [], []>, precision = #tpu.contract_precision<fp32>} : vector<8x8xf32>, vector<8x16xf32>, vector<8x16xf32> -> vector<8x16xf32>
    %22 = arith.addf %17, %21 : vector<8x16xf32>
    %23 = vector.extract_strided_slice %0 {offsets = [0, 16], sizes = [8, 16], strides = [1, 1]} : vector<8x32xf32> to vector<8x16xf32>
    %24 = vector.extract_strided_slice %23 {offsets = [0, 1], sizes = [8, 1], strides = [1, 1]} : vector<8x16xf32> to vector<8x1xf32>
    %25 = vector.extract_strided_slice %23 {offsets = [0, 14], sizes = [8, 1], strides = [1, 1]} : vector<8x16xf32> to vector<8x1xf32>
    %26 = tpu.concatenate %24, %23, %25 in 1 : vector<8x1xf32>, vector<8x16xf32>, vector<8x1xf32> -> vector<8x18xf32>
    %27 = vector.extract_strided_slice %26 {offsets = [0, 0], sizes = [8, 16], strides = [1, 1]} : vector<8x18xf32> to vector<8x16xf32>
    %c0_12 = arith.constant 0 : index
    %c0_13 = arith.constant 0 : index
    %c0_14 = arith.constant 0 : index
    %28 = vector.load %arg2[%c0_12, %c0_13, %c0_14] : memref<3x8x8xf32, #tpu.memory_space<vmem>>, vector<1x8x8xf32>
    %29 = vector.shape_cast %28 : vector<1x8x8xf32> to vector<8x8xf32>
    %cst_15 = arith.constant dense<0.000000e+00> : vector<8x16xf32>
    %30 = tpu.matmul %29, %27, %cst_15 {dimension_numbers = #tpu.dot_dimension_numbers<[1], [0], [0], [1], [0, 0, 1, 1], [], []>, precision = #tpu.contract_precision<fp32>} : vector<8x8xf32>, vector<8x16xf32>, vector<8x16xf32> -> vector<8x16xf32>
    %31 = arith.addf %3, %30 : vector<8x16xf32>
    %32 = vector.extract_strided_slice %26 {offsets = [0, 1], sizes = [8, 16], strides = [1, 1]} : vector<8x18xf32> to vector<8x16xf32>
    %c1_16 = arith.constant 1 : index
    %c0_17 = arith.constant 0 : index
    %c0_18 = arith.constant 0 : index
    %33 = vector.load %arg2[%c1_16, %c0_17, %c0_18] : memref<3x8x8xf32, #tpu.memory_space<vmem>>, vector<1x8x8xf32>
    %34 = vector.shape_cast %33 : vector<1x8x8xf32> to vector<8x8xf32>
    %cst_19 = arith.constant dense<0.000000e+00> : vector<8x16xf32>
    %35 = tpu.matmul %34, %32, %cst_19 {dimension_numbers = #tpu.dot_dimension_numbers<[1], [0], [0], [1], [0, 0, 1, 1], [], []>, precision = #tpu.contract_precision<fp32>} : vector<8x8xf32>, vector<8x16xf32>, vector<8x16xf32> -> vector<8x16xf32>
    %36 = arith.addf %31, %35 : vector<8x16xf32>
    %37 = vector.extract_strided_slice %26 {offsets = [0, 2], sizes = [8, 16], strides = [1, 1]} : vector<8x18xf32> to vector<8x16xf32>
    %c2_20 = arith.constant 2 : index
    %c0_21 = arith.constant 0 : index
    %c0_22 = arith.constant 0 : index
    %38 = vector.load %arg2[%c2_20, %c0_21, %c0_22] : memref<3x8x8xf32, #tpu.memory_space<vmem>>, vector<1x8x8xf32>
    %39 = vector.shape_cast %38 : vector<1x8x8xf32> to vector<8x8xf32>
    %cst_23 = arith.constant dense<0.000000e+00> : vector<8x16xf32>
    %40 = tpu.matmul %39, %37, %cst_23 {dimension_numbers = #tpu.dot_dimension_numbers<[1], [0], [0], [1], [0, 0, 1, 1], [], []>, precision = #tpu.contract_precision<fp32>} : vector<8x8xf32>, vector<8x16xf32>, vector<8x16xf32> -> vector<8x16xf32>
    %41 = arith.addf %36, %40 : vector<8x16xf32>
    %42 = tpu.concatenate %22, %41 in 1 : vector<8x16xf32>, vector<8x16xf32> -> vector<8x32xf32>
    %c0_24 = arith.constant 0 : index
    %c0_25 = arith.constant 0 : index
    %43 = vector.load %arg4[%c0_24, %c0_25] : memref<8x32xf32, #tpu.memory_space<vmem>>, vector<8x32xf32>
    tpu.vector_store %arg4[%c0_24, %c0_25], %42 {strides = array<i32>} : memref<8x32xf32, #tpu.memory_space<vmem>>, vector<8x32xf32>,
    %cst_26 = arith.constant dense<0.000000e+00> : vector<8xf32>
    %44 = vector.multi_reduction <add>, %42, %cst_26 [1] : vector<8x32xf32> to vector<8xf32>
    %45 = vector.shape_cast %44 : vector<8xf32> to vector<8x1xf32>
    %cst_27 = arith.constant 3.125000e-02 : f32
    %46 = vector.broadcast %cst_27 : f32 to vector<8x1xf32>
    %47 = arith.mulf %45, %46 : vector<8x1xf32>
    %48 = vector.broadcast %47 : vector<8x1xf32> to vector<8x32xf32>
    %49 = arith.subf %42, %48 : vector<8x32xf32>
    %50 = arith.mulf %49, %49 : vector<8x32xf32>
    %cst_28 = arith.constant dense<0.000000e+00> : vector<8xf32>
    %51 = vector.multi_reduction <add>, %50, %cst_28 [1] : vector<8x32xf32> to vector<8xf32>
    %52 = vector.shape_cast %51 : vector<8xf32> to vector<8x1xf32>
    %53 = tpu.concatenate %45, %52 in 1 : vector<8x1xf32>, vector<8x1xf32> -> vector<8x2xf32>
    %c0_29 = arith.constant 0 : index
    %c0_30 = arith.constant 0 : index
    %c0_31 = arith.constant 0 : index
    %54 = vector.load %arg5[%c0_29, %c0_30, %c0_31] : memref<1x8x2xf32, #tpu.memory_space<vmem>>, vector<1x8x2xf32>
    %55 = vector.shape_cast %54 : vector<1x8x2xf32> to vector<8x2xf32>
    %56 = vector.shape_cast %53 : vector<8x2xf32> to vector<1x8x2xf32>
    tpu.vector_store %arg5[%c0_29, %c0_30, %c0_31], %56 {strides = array<i32>} : memref<1x8x2xf32, #tpu.memory_space<vmem>>, vector<1x8x2xf32>,
    %cst_32 = arith.constant dense<0.000000e+00> : vector<8xf32>
    %57 = vector.multi_reduction <add>, %0, %cst_32 [1] : vector<8x32xf32> to vector<8xf32>
    %58 = vector.shape_cast %57 : vector<8xf32> to vector<8x1xf32>
    %cst_33 = arith.constant 3.125000e-02 : f32
    %59 = vector.broadcast %cst_33 : f32 to vector<8x1xf32>
    %60 = arith.mulf %58, %59 : vector<8x1xf32>
    %61 = vector.broadcast %60 : vector<8x1xf32> to vector<8x32xf32>
    %62 = arith.subf %0, %61 : vector<8x32xf32>
    %63 = arith.mulf %62, %62 : vector<8x32xf32>
    %cst_34 = arith.constant dense<0.000000e+00> : vector<8xf32>
    %64 = vector.multi_reduction <add>, %63, %cst_34 [1] : vector<8x32xf32> to vector<8xf32>
    %65 = vector.shape_cast %64 : vector<8xf32> to vector<8x1xf32>
    %66 = tpu.concatenate %58, %65 in 1 : vector<8x1xf32>, vector<8x1xf32> -> vector<8x2xf32>
    %c0_35 = arith.constant 0 : index
    %c0_36 = arith.constant 0 : index
    %c0_37 = arith.constant 0 : index
    %67 = vector.load %arg6[%c0_35, %c0_36, %c0_37] : memref<1x8x2xf32, #tpu.memory_space<vmem>>, vector<1x8x2xf32>
    %68 = vector.shape_cast %67 : vector<1x8x2xf32> to vector<8x2xf32>
    %69 = vector.shape_cast %66 : vector<8x2xf32> to vector<1x8x2xf32>
    tpu.vector_store %arg6[%c0_35, %c0_36, %c0_37], %69 {strides = array<i32>} : memref<1x8x2xf32, #tpu.memory_space<vmem>>, vector<1x8x2xf32>,
    return
  }
  func.func @transform_0(%arg0: i32) -> (i32, i32) {
    %c0_i32 = arith.constant 0 : i32
    %c0_i32_0 = arith.constant 0 : i32
    return %c0_i32, %arg0 : i32, i32
  }
  func.func @transform_1(%arg0: i32) -> (i32, i32, i32) {
    %c0_i32 = arith.constant 0 : i32
    %c0_i32_0 = arith.constant 0 : i32
    %c0_i32_1 = arith.constant 0 : i32
    %c0_i32_2 = arith.constant 0 : i32
    return %c0_i32, %c0_i32_0, %c0_i32_1 : i32, i32, i32
  }
  func.func @transform_2(%arg0: i32) -> (i32, i32) {
    %c0_i32 = arith.constant 0 : i32
    %c0_i32_0 = arith.constant 0 : i32
    %c0_i32_1 = arith.constant 0 : i32
    return %c0_i32, %c0_i32_0 : i32, i32
  }
  func.func @transform_3(%arg0: i32) -> (i32, i32) {
    %c0_i32 = arith.constant 0 : i32
    %c0_i32_0 = arith.constant 0 : i32
    return %c0_i32, %arg0 : i32, i32
  }
  func.func @transform_4(%arg0: i32) -> (i32, i32, i32) {
    %c0_i32 = arith.constant 0 : i32
    %c0_i32_0 = arith.constant 0 : i32
    %c0_i32_1 = arith.constant 0 : i32
    return %arg0, %c0_i32, %c0_i32_0 : i32, i32, i32
  }
  func.func @transform_5(%arg0: i32) -> (i32, i32, i32) {
    %c0_i32 = arith.constant 0 : i32
    %c0_i32_0 = arith.constant 0 : i32
    %c0_i32_1 = arith.constant 0 : i32
    return %arg0, %c0_i32, %c0_i32_0 : i32, i32, i32
  }
}

module attributes {stable_mosaic.version = 11 : i64} {
  func.func @_stage3_kernel(%arg0: i32, %arg1: memref<8x32xf32, #tpu.memory_space<vmem>>, %arg2: memref<8x32xf32, #tpu.memory_space<vmem>>, %arg3: memref<8x1xf32, #tpu.memory_space<vmem>>, %arg4: memref<8x1xf32, #tpu.memory_space<vmem>>, %arg5: memref<8x1xf32, #tpu.memory_space<vmem>>, %arg6: memref<8x1xf32, #tpu.memory_space<vmem>>, %arg7: memref<8x32xf32, #tpu.memory_space<vmem>>) attributes {dimension_semantics = [#tpu.dimension_semantics<parallel>], iteration_bounds = array<i64: 1>, scalar_prefetch = 0 : i64, scratch_operands = 0 : i64, tpu.core_type = #tpu.core_type<tc>, window_params = [{transform_indices = @transform_0, window_bounds = array<i64: 8, 32>}, {transform_indices = @transform_1, window_bounds = array<i64: 8, 32>}, {pipeline_mode = #tpu.pipeline_mode<synchronous>, transform_indices = @transform_2, window_bounds = array<i64: 8, 1>}, {pipeline_mode = #tpu.pipeline_mode<synchronous>, transform_indices = @transform_3, window_bounds = array<i64: 8, 1>}, {pipeline_mode = #tpu.pipeline_mode<synchronous>, transform_indices = @transform_4, window_bounds = array<i64: 8, 1>}, {pipeline_mode = #tpu.pipeline_mode<synchronous>, transform_indices = @transform_5, window_bounds = array<i64: 8, 1>}, {transform_indices = @transform_6, window_bounds = array<i64: 8, 32>}]} {
    %c0 = arith.constant 0 : index
    %c0_0 = arith.constant 0 : index
    %0 = vector.load %arg1[%c0, %c0_0] : memref<8x32xf32, #tpu.memory_space<vmem>>, vector<8x32xf32>
    %c0_1 = arith.constant 0 : index
    %c0_2 = arith.constant 0 : index
    %1 = vector.load %arg3[%c0_1, %c0_2] : memref<8x1xf32, #tpu.memory_space<vmem>>, vector<8x1xf32>
    %2 = vector.broadcast %1 : vector<8x1xf32> to vector<8x32xf32>
    %3 = arith.mulf %0, %2 : vector<8x32xf32>
    %c0_3 = arith.constant 0 : index
    %c0_4 = arith.constant 0 : index
    %4 = vector.load %arg4[%c0_3, %c0_4] : memref<8x1xf32, #tpu.memory_space<vmem>>, vector<8x1xf32>
    %5 = vector.broadcast %4 : vector<8x1xf32> to vector<8x32xf32>
    %6 = arith.addf %3, %5 : vector<8x32xf32>
    %c0_5 = arith.constant 0 : index
    %c0_6 = arith.constant 0 : index
    %7 = vector.load %arg2[%c0_5, %c0_6] : memref<8x32xf32, #tpu.memory_space<vmem>>, vector<8x32xf32>
    %c0_7 = arith.constant 0 : index
    %c0_8 = arith.constant 0 : index
    %8 = vector.load %arg5[%c0_7, %c0_8] : memref<8x1xf32, #tpu.memory_space<vmem>>, vector<8x1xf32>
    %9 = vector.broadcast %8 : vector<8x1xf32> to vector<8x32xf32>
    %10 = arith.mulf %7, %9 : vector<8x32xf32>
    %11 = arith.addf %6, %10 : vector<8x32xf32>
    %c0_9 = arith.constant 0 : index
    %c0_10 = arith.constant 0 : index
    %12 = vector.load %arg6[%c0_9, %c0_10] : memref<8x1xf32, #tpu.memory_space<vmem>>, vector<8x1xf32>
    %13 = vector.broadcast %12 : vector<8x1xf32> to vector<8x32xf32>
    %14 = arith.addf %11, %13 : vector<8x32xf32>
    %cst = arith.constant 0.707106769 : f32
    %15 = vector.broadcast %cst : f32 to vector<8x32xf32>
    %16 = arith.mulf %14, %15 : vector<8x32xf32>
    %cst_11 = arith.constant 0.000000e+00 : f32
    %17 = vector.broadcast %cst_11 : f32 to vector<8x32xf32>
    %18 = arith.maximumf %16, %17 : vector<8x32xf32>
    %c0_12 = arith.constant 0 : index
    %c0_13 = arith.constant 0 : index
    %19 = vector.load %arg7[%c0_12, %c0_13] : memref<8x32xf32, #tpu.memory_space<vmem>>, vector<8x32xf32>
    tpu.vector_store %arg7[%c0_12, %c0_13], %18 {strides = array<i32>} : memref<8x32xf32, #tpu.memory_space<vmem>>, vector<8x32xf32>,
    return
  }
  func.func @transform_0(%arg0: i32) -> (i32, i32) {
    %c0_i32 = arith.constant 0 : i32
    %c0_i32_0 = arith.constant 0 : i32
    return %c0_i32, %arg0 : i32, i32
  }
  func.func @transform_1(%arg0: i32) -> (i32, i32) {
    %c0_i32 = arith.constant 0 : i32
    %c0_i32_0 = arith.constant 0 : i32
    return %c0_i32, %arg0 : i32, i32
  }
  func.func @transform_2(%arg0: i32) -> (i32, i32) {
    %c0_i32 = arith.constant 0 : i32
    %c0_i32_0 = arith.constant 0 : i32
    %c0_i32_1 = arith.constant 0 : i32
    return %c0_i32, %c0_i32_0 : i32, i32
  }
  func.func @transform_3(%arg0: i32) -> (i32, i32) {
    %c0_i32 = arith.constant 0 : i32
    %c0_i32_0 = arith.constant 0 : i32
    %c0_i32_1 = arith.constant 0 : i32
    return %c0_i32, %c0_i32_0 : i32, i32
  }
  func.func @transform_4(%arg0: i32) -> (i32, i32) {
    %c0_i32 = arith.constant 0 : i32
    %c0_i32_0 = arith.constant 0 : i32
    %c0_i32_1 = arith.constant 0 : i32
    return %c0_i32, %c0_i32_0 : i32, i32
  }
  func.func @transform_5(%arg0: i32) -> (i32, i32) {
    %c0_i32 = arith.constant 0 : i32
    %c0_i32_0 = arith.constant 0 : i32
    %c0_i32_1 = arith.constant 0 : i32
    return %c0_i32, %c0_i32_0 : i32, i32
  }
  func.func @transform_6(%arg0: i32) -> (i32, i32) {
    %c0_i32 = arith.constant 0 : i32
    %c0_i32_0 = arith.constant 0 : i32
    return %c0_i32, %arg0 : i32, i32
  }
}

module attributes {stable_mosaic.version = 11 : i64} {
  func.func @_stage2_kernel(%arg0: i32, %arg1: memref<8x32xf32, #tpu.memory_space<vmem>>, %arg2: memref<8x1xf32, #tpu.memory_space<vmem>>, %arg3: memref<8x1xf32, #tpu.memory_space<vmem>>, %arg4: memref<3x8x8xf32, #tpu.memory_space<vmem>>, %arg5: memref<8x1xf32, #tpu.memory_space<vmem>>, %arg6: memref<8x32xf32, #tpu.memory_space<vmem>>, %arg7: memref<1x8x2xf32, #tpu.memory_space<vmem>>) attributes {dimension_semantics = [#tpu.dimension_semantics<parallel>], iteration_bounds = array<i64: 1>, scalar_prefetch = 0 : i64, scratch_operands = 0 : i64, tpu.core_type = #tpu.core_type<tc>, window_params = [{transform_indices = @transform_0, window_bounds = array<i64: 8, 32>}, {pipeline_mode = #tpu.pipeline_mode<synchronous>, transform_indices = @transform_1, window_bounds = array<i64: 8, 1>}, {pipeline_mode = #tpu.pipeline_mode<synchronous>, transform_indices = @transform_2, window_bounds = array<i64: 8, 1>}, {pipeline_mode = #tpu.pipeline_mode<synchronous>, transform_indices = @transform_3, window_bounds = array<i64: 3, 8, 8>}, {pipeline_mode = #tpu.pipeline_mode<synchronous>, transform_indices = @transform_4, window_bounds = array<i64: 8, 1>}, {transform_indices = @transform_5, window_bounds = array<i64: 8, 32>}, {transform_indices = @transform_6, window_bounds = array<i64: 1, 8, 2>}]} {
    %c0 = arith.constant 0 : index
    %c0_0 = arith.constant 0 : index
    %0 = vector.load %arg1[%c0, %c0_0] : memref<8x32xf32, #tpu.memory_space<vmem>>, vector<8x32xf32>
    %c0_1 = arith.constant 0 : index
    %c0_2 = arith.constant 0 : index
    %1 = vector.load %arg2[%c0_1, %c0_2] : memref<8x1xf32, #tpu.memory_space<vmem>>, vector<8x1xf32>
    %2 = vector.broadcast %1 : vector<8x1xf32> to vector<8x32xf32>
    %3 = arith.mulf %0, %2 : vector<8x32xf32>
    %c0_3 = arith.constant 0 : index
    %c0_4 = arith.constant 0 : index
    %4 = vector.load %arg3[%c0_3, %c0_4] : memref<8x1xf32, #tpu.memory_space<vmem>>, vector<8x1xf32>
    %5 = vector.broadcast %4 : vector<8x1xf32> to vector<8x32xf32>
    %6 = arith.addf %3, %5 : vector<8x32xf32>
    %cst = arith.constant 0.000000e+00 : f32
    %7 = vector.broadcast %cst : f32 to vector<8x32xf32>
    %8 = arith.maximumf %6, %7 : vector<8x32xf32>
    %c0_5 = arith.constant 0 : index
    %c0_6 = arith.constant 0 : index
    %9 = vector.load %arg5[%c0_5, %c0_6] : memref<8x1xf32, #tpu.memory_space<vmem>>, vector<8x1xf32>
    %10 = vector.shape_cast %9 : vector<8x1xf32> to vector<8x1xf32>
    %11 = vector.broadcast %10 : vector<8x1xf32> to vector<8x16xf32>
    %12 = vector.extract_strided_slice %8 {offsets = [0, 0], sizes = [8, 16], strides = [1, 1]} : vector<8x32xf32> to vector<8x16xf32>
    %13 = vector.extract_strided_slice %12 {offsets = [0, 1], sizes = [8, 1], strides = [1, 1]} : vector<8x16xf32> to vector<8x1xf32>
    %14 = vector.extract_strided_slice %12 {offsets = [0, 14], sizes = [8, 1], strides = [1, 1]} : vector<8x16xf32> to vector<8x1xf32>
    %15 = tpu.concatenate %13, %12, %14 in 1 : vector<8x1xf32>, vector<8x16xf32>, vector<8x1xf32> -> vector<8x18xf32>
    %16 = vector.extract_strided_slice %15 {offsets = [0, 0], sizes = [8, 16], strides = [1, 1]} : vector<8x18xf32> to vector<8x16xf32>
    %c0_7 = arith.constant 0 : index
    %c0_8 = arith.constant 0 : index
    %c0_9 = arith.constant 0 : index
    %17 = vector.load %arg4[%c0_7, %c0_8, %c0_9] : memref<3x8x8xf32, #tpu.memory_space<vmem>>, vector<1x8x8xf32>
    %18 = vector.shape_cast %17 : vector<1x8x8xf32> to vector<8x8xf32>
    %cst_10 = arith.constant dense<0.000000e+00> : vector<8x16xf32>
    %19 = tpu.matmul %18, %16, %cst_10 {dimension_numbers = #tpu.dot_dimension_numbers<[1], [0], [0], [1], [0, 0, 1, 1], [], []>, precision = #tpu.contract_precision<fp32>} : vector<8x8xf32>, vector<8x16xf32>, vector<8x16xf32> -> vector<8x16xf32>
    %20 = arith.addf %11, %19 : vector<8x16xf32>
    %21 = vector.extract_strided_slice %15 {offsets = [0, 1], sizes = [8, 16], strides = [1, 1]} : vector<8x18xf32> to vector<8x16xf32>
    %c1 = arith.constant 1 : index
    %c0_11 = arith.constant 0 : index
    %c0_12 = arith.constant 0 : index
    %22 = vector.load %arg4[%c1, %c0_11, %c0_12] : memref<3x8x8xf32, #tpu.memory_space<vmem>>, vector<1x8x8xf32>
    %23 = vector.shape_cast %22 : vector<1x8x8xf32> to vector<8x8xf32>
    %cst_13 = arith.constant dense<0.000000e+00> : vector<8x16xf32>
    %24 = tpu.matmul %23, %21, %cst_13 {dimension_numbers = #tpu.dot_dimension_numbers<[1], [0], [0], [1], [0, 0, 1, 1], [], []>, precision = #tpu.contract_precision<fp32>} : vector<8x8xf32>, vector<8x16xf32>, vector<8x16xf32> -> vector<8x16xf32>
    %25 = arith.addf %20, %24 : vector<8x16xf32>
    %26 = vector.extract_strided_slice %15 {offsets = [0, 2], sizes = [8, 16], strides = [1, 1]} : vector<8x18xf32> to vector<8x16xf32>
    %c2 = arith.constant 2 : index
    %c0_14 = arith.constant 0 : index
    %c0_15 = arith.constant 0 : index
    %27 = vector.load %arg4[%c2, %c0_14, %c0_15] : memref<3x8x8xf32, #tpu.memory_space<vmem>>, vector<1x8x8xf32>
    %28 = vector.shape_cast %27 : vector<1x8x8xf32> to vector<8x8xf32>
    %cst_16 = arith.constant dense<0.000000e+00> : vector<8x16xf32>
    %29 = tpu.matmul %28, %26, %cst_16 {dimension_numbers = #tpu.dot_dimension_numbers<[1], [0], [0], [1], [0, 0, 1, 1], [], []>, precision = #tpu.contract_precision<fp32>} : vector<8x8xf32>, vector<8x16xf32>, vector<8x16xf32> -> vector<8x16xf32>
    %30 = arith.addf %25, %29 : vector<8x16xf32>
    %31 = vector.extract_strided_slice %8 {offsets = [0, 16], sizes = [8, 16], strides = [1, 1]} : vector<8x32xf32> to vector<8x16xf32>
    %32 = vector.extract_strided_slice %31 {offsets = [0, 1], sizes = [8, 1], strides = [1, 1]} : vector<8x16xf32> to vector<8x1xf32>
    %33 = vector.extract_strided_slice %31 {offsets = [0, 14], sizes = [8, 1], strides = [1, 1]} : vector<8x16xf32> to vector<8x1xf32>
    %34 = tpu.concatenate %32, %31, %33 in 1 : vector<8x1xf32>, vector<8x16xf32>, vector<8x1xf32> -> vector<8x18xf32>
    %35 = vector.extract_strided_slice %34 {offsets = [0, 0], sizes = [8, 16], strides = [1, 1]} : vector<8x18xf32> to vector<8x16xf32>
    %c0_17 = arith.constant 0 : index
    %c0_18 = arith.constant 0 : index
    %c0_19 = arith.constant 0 : index
    %36 = vector.load %arg4[%c0_17, %c0_18, %c0_19] : memref<3x8x8xf32, #tpu.memory_space<vmem>>, vector<1x8x8xf32>
    %37 = vector.shape_cast %36 : vector<1x8x8xf32> to vector<8x8xf32>
    %cst_20 = arith.constant dense<0.000000e+00> : vector<8x16xf32>
    %38 = tpu.matmul %37, %35, %cst_20 {dimension_numbers = #tpu.dot_dimension_numbers<[1], [0], [0], [1], [0, 0, 1, 1], [], []>, precision = #tpu.contract_precision<fp32>} : vector<8x8xf32>, vector<8x16xf32>, vector<8x16xf32> -> vector<8x16xf32>
    %39 = arith.addf %11, %38 : vector<8x16xf32>
    %40 = vector.extract_strided_slice %34 {offsets = [0, 1], sizes = [8, 16], strides = [1, 1]} : vector<8x18xf32> to vector<8x16xf32>
    %c1_21 = arith.constant 1 : index
    %c0_22 = arith.constant 0 : index
    %c0_23 = arith.constant 0 : index
    %41 = vector.load %arg4[%c1_21, %c0_22, %c0_23] : memref<3x8x8xf32, #tpu.memory_space<vmem>>, vector<1x8x8xf32>
    %42 = vector.shape_cast %41 : vector<1x8x8xf32> to vector<8x8xf32>
    %cst_24 = arith.constant dense<0.000000e+00> : vector<8x16xf32>
    %43 = tpu.matmul %42, %40, %cst_24 {dimension_numbers = #tpu.dot_dimension_numbers<[1], [0], [0], [1], [0, 0, 1, 1], [], []>, precision = #tpu.contract_precision<fp32>} : vector<8x8xf32>, vector<8x16xf32>, vector<8x16xf32> -> vector<8x16xf32>
    %44 = arith.addf %39, %43 : vector<8x16xf32>
    %45 = vector.extract_strided_slice %34 {offsets = [0, 2], sizes = [8, 16], strides = [1, 1]} : vector<8x18xf32> to vector<8x16xf32>
    %c2_25 = arith.constant 2 : index
    %c0_26 = arith.constant 0 : index
    %c0_27 = arith.constant 0 : index
    %46 = vector.load %arg4[%c2_25, %c0_26, %c0_27] : memref<3x8x8xf32, #tpu.memory_space<vmem>>, vector<1x8x8xf32>
    %47 = vector.shape_cast %46 : vector<1x8x8xf32> to vector<8x8xf32>
    %cst_28 = arith.constant dense<0.000000e+00> : vector<8x16xf32>
    %48 = tpu.matmul %47, %45, %cst_28 {dimension_numbers = #tpu.dot_dimension_numbers<[1], [0], [0], [1], [0, 0, 1, 1], [], []>, precision = #tpu.contract_precision<fp32>} : vector<8x8xf32>, vector<8x16xf32>, vector<8x16xf32> -> vector<8x16xf32>
    %49 = arith.addf %44, %48 : vector<8x16xf32>
    %50 = tpu.concatenate %30, %49 in 1 : vector<8x16xf32>, vector<8x16xf32> -> vector<8x32xf32>
    %c0_29 = arith.constant 0 : index
    %c0_30 = arith.constant 0 : index
    %51 = vector.load %arg6[%c0_29, %c0_30] : memref<8x32xf32, #tpu.memory_space<vmem>>, vector<8x32xf32>
    tpu.vector_store %arg6[%c0_29, %c0_30], %50 {strides = array<i32>} : memref<8x32xf32, #tpu.memory_space<vmem>>, vector<8x32xf32>,
    %cst_31 = arith.constant dense<0.000000e+00> : vector<8xf32>
    %52 = vector.multi_reduction <add>, %50, %cst_31 [1] : vector<8x32xf32> to vector<8xf32>
    %53 = vector.shape_cast %52 : vector<8xf32> to vector<8x1xf32>
    %cst_32 = arith.constant 3.125000e-02 : f32
    %54 = vector.broadcast %cst_32 : f32 to vector<8x1xf32>
    %55 = arith.mulf %53, %54 : vector<8x1xf32>
    %56 = vector.broadcast %55 : vector<8x1xf32> to vector<8x32xf32>
    %57 = arith.subf %50, %56 : vector<8x32xf32>
    %58 = arith.mulf %57, %57 : vector<8x32xf32>
    %cst_33 = arith.constant dense<0.000000e+00> : vector<8xf32>
    %59 = vector.multi_reduction <add>, %58, %cst_33 [1] : vector<8x32xf32> to vector<8xf32>
    %60 = vector.shape_cast %59 : vector<8xf32> to vector<8x1xf32>
    %61 = tpu.concatenate %53, %60 in 1 : vector<8x1xf32>, vector<8x1xf32> -> vector<8x2xf32>
    %c0_34 = arith.constant 0 : index
    %c0_35 = arith.constant 0 : index
    %c0_36 = arith.constant 0 : index
    %62 = vector.load %arg7[%c0_34, %c0_35, %c0_36] : memref<1x8x2xf32, #tpu.memory_space<vmem>>, vector<1x8x2xf32>
    %63 = vector.shape_cast %62 : vector<1x8x2xf32> to vector<8x2xf32>
    %64 = vector.shape_cast %61 : vector<8x2xf32> to vector<1x8x2xf32>
    tpu.vector_store %arg7[%c0_34, %c0_35, %c0_36], %64 {strides = array<i32>} : memref<1x8x2xf32, #tpu.memory_space<vmem>>, vector<1x8x2xf32>,
    return
  }
  func.func @transform_0(%arg0: i32) -> (i32, i32) {
    %c0_i32 = arith.constant 0 : i32
    %c0_i32_0 = arith.constant 0 : i32
    return %c0_i32, %arg0 : i32, i32
  }
  func.func @transform_1(%arg0: i32) -> (i32, i32) {
    %c0_i32 = arith.constant 0 : i32
    %c0_i32_0 = arith.constant 0 : i32
    %c0_i32_1 = arith.constant 0 : i32
    return %c0_i32, %c0_i32_0 : i32, i32
  }
  func.func @transform_2(%arg0: i32) -> (i32, i32) {
    %c0_i32 = arith.constant 0 : i32
    %c0_i32_0 = arith.constant 0 : i32
    %c0_i32_1 = arith.constant 0 : i32
    return %c0_i32, %c0_i32_0 : i32, i32
  }
  func.func @transform_3(%arg0: i32) -> (i32, i32, i32) {
    %c0_i32 = arith.constant 0 : i32
    %c0_i32_0 = arith.constant 0 : i32
    %c0_i32_1 = arith.constant 0 : i32
    %c0_i32_2 = arith.constant 0 : i32
    return %c0_i32, %c0_i32_0, %c0_i32_1 : i32, i32, i32
  }
  func.func @transform_4(%arg0: i32) -> (i32, i32) {
    %c0_i32 = arith.constant 0 : i32
    %c0_i32_0 = arith.constant 0 : i32
    %c0_i32_1 = arith.constant 0 : i32
    return %c0_i32, %c0_i32_0 : i32, i32
  }
  func.func @transform_5(%arg0: i32) -> (i32, i32) {
    %c0_i32 = arith.constant 0 : i32
    %c0_i32_0 = arith.constant 0 : i32
    return %c0_i32, %arg0 : i32, i32
  }
  func.func @transform_6(%arg0: i32) -> (i32, i32, i32) {
    %c0_i32 = arith.constant 0 : i32
    %c0_i32_0 = arith.constant 0 : i32
    %c0_i32_1 = arith.constant 0 : i32
    return %arg0, %c0_i32, %c0_i32_0 : i32, i32, i32
  }
}

</mosaic_0001>

<bundles_post_ra>
// kernel: skip2_conv_norm_acti_1d.5
= control target key start
LH: loop header
LB: loop body
LE: loop exit
PB: predicated region body
PF: predicated region fallthrough
CT: control target
= control target key end

     0   :  { %v65_v0 = vmov 0   ;;  %vm56_vm0 = vcmask 261120   ;;  %s122_s4 = inlined_call_operand.vmem [shape: f32[8,1], index: 4, kind: input, shape index: {}]   ;;  %s123_s2 = inlined_call_operand.vmem [shape: f32[8,1], index: 2, kind: input, shape index: {}]   ;;  %s124_s5 = inlined_call_operand.vmem [shape: f32[8,1], index: 5, kind: input, shape index: {}]   ;;  %s125_s3 = inlined_call_operand.vmem [shape: f32[8,1], index: 3, kind: input, shape index: {}]   ;;  %s126_s1 = inlined_call_operand.vmem [shape: f32[8,32], index: 1, kind: input, shape index: {}]   ;;  %s127_s0 = inlined_call_operand.vmem [shape: f32[8,32], index: 0, kind: input, shape index: {}, may-alias: {0,6}]   ;;  %s128_s6 = inlined_call_operand.vmem [shape: f32[8,32], index: 6, kind: output, shape index: {}, may-alias: {0,6}]  }
   0x1   :  { %64 = vset.pattern.permute.xlu1 %v65_v0  ;;  %63 = vset.pattern.permute.xlu0 %v65_v0  ;;  %v39_v1 = vld [vmem:[%s122_s4] sm:$0xff] }
   0x2   :  { %v24_v2 = vld [vmem:[%s123_s2] sm:$0xff]  ;;  %42 = vperm.xlu1 %64, %v39_v1  }
   0x3   :  { %27 = vperm.xlu0 %63, %v24_v2   ;;  %v47_v3 = vld [vmem:[%s124_s5] sm:$0xff] }
   0x4   :  { %v31_v4 = vld [vmem:[%s125_s3] sm:$0xff] }
   0x5   :  { %v38_v5 = vld [vmem:[%s126_s1] sm:$0xff] }
   0x6   :  { %50 = vperm.xlu1 %64, %v47_v3   ;;  %v23_v7 = vld [vmem:[%s127_s0] sm:$0xff] }
   0x7   :  { %34 = vperm.xlu0 %63, %v31_v4  }
  0x81   :  { %v43_v8 = vpop.permute.xlu1 %42 }
  0x82   :  { %v28_v6 = vpop.permute.xlu0 %27  ;;  %v45_v9 = vmul.f32 %v43_v8, %v38_v5 }
  0x83   :  { %v30_v10 = vmul.f32 %v28_v6, %v23_v7 }
  0x85   :  { %v51_v14 = vpop.permute.xlu1 %50 }
  0x86   :  { %v35_v11 = vpop.permute.xlu0 %34 }
  0x87   :  { %v37_v12 = vadd.f32 %v35_v11, %v30_v10 }
  0x89   :  { %v46_v13 = vadd.f32 %v45_v9, %v37_v12 }
  0x8b   :  { %v53_v15 = vadd.f32 %v51_v14, %v46_v13 }
  0x8d   :  { %v54_v16 = vmul.f32 0.70710677, %v53_v15 }
  0x8f   :  { %v55_v17 = vmax.f32 %v54_v16, 0.0 }
  0x91   :  { %57 = vst.msk [vmem:[%s128_s6] sm:$0xff] %vm56_vm0, %v55_v17 }

// kernel: skip2_conv_norm_acti_1d.3
= control target key start
LH: loop header
LB: loop body
LE: loop exit
PB: predicated region body
PF: predicated region fallthrough
CT: control target
= control target key end

     0   :  { %v3139_v1 = vmov 0.0   ;;  %vm3140_vm0 = vmmov 0   ;;  %s3141_s20 = smov 111   ;;  %s3142_s21 = smov 115   ;;  %vm39_vm1 = vcmask 64512   ;;  %vm34_vm2 = vcmask 7168   ;;  %s3364_s0 = inlined_call_operand.vmem [shape: f32[8,32], index: 0, kind: input, shape index: {}]   ;;  %s3365_s1 = inlined_call_operand.vmem [shape: f32[3,8,8], index: 1, kind: input, shape index: {}]   ;;  %s3366_s2 = inlined_call_operand.vmem [shape: f32[8,1], index: 2, kind: input, shape index: {}]   ;;  %s3367_s3 = inlined_call_operand.vmem [shape: f32[8,32], index: 3, kind: output, shape index: {0}]   ;;  %s3368_s5 = inlined_call_operand.vmem [shape: f32[1,8,2], index: 5, kind: output, shape index: {2}]   ;;  %s3369_s4 = inlined_call_operand.vmem [shape: f32[1,8,2], index: 4, kind: output, shape index: {1}]  }
   0x1   :  { %v3183_v0 = vld [vmem:[%s3364_s0] sm:$0xff]  ;;  %2967 = vmatprep.subr.mxu1 %v3139_v1  ;;  %2969 = vmatprep.mubr.msk.f32.mxu1 %vm3140_vm0, %v3139_v1  ;;  %s3143_s0 = smov 113   ;;  %s3144_s22 = smov 127   ;;  %vm36_vm3 = vcmask 138240   ;;  %v3148_v29 = vmov 0   ;;  %v2803_v31 = vld [vmem:[%s3365_s1 + $0x8] sm:$0xff] }
   0x2   :  { %1401 = vrot.lane.b32.xlu0 %v3183_v0, %s3141_s20  ;;  %1407 = vrot.lane.b32.xlu1 %v3183_v0, %s3142_s21  ;;  %s3145_s23 = smov 1   ;;  %s3146_s24 = smov 3   ;;  %v38_v2 = vld [vmem:[%s3365_s1] sm:$0xff]  ;;  %v497_v32 = vsel %vm39_vm1, %v2803_v31, 0  ;;  %vm2766_vm4 = vcmask 261120   ;;  %v2804_v51 = vld [vmem:[%s3365_s1 + $0x10] sm:$0xff] }
   0x3   :  { %2877 = vmatprep.subr.mxu0 %v3139_v1  ;;  %2879 = vmatprep.mubr.msk.f32.mxu0 %vm3140_vm0, %v3139_v1  ;;  %v41_v3 = vsel %vm39_vm1, %v38_v2, 0  ;;  %s3147_s27 = smov 126   ;;  %v18_v30 = vld [vmem:[%s3366_s2] sm:$0xff]  ;;  %v3258_v33 = vand.u32 4294901760, %v497_v32  ;;  %v2780_v37 = vsel %vm2766_vm4, %v3183_v0, 0.0  ;;  %v952_v52 = vsel %vm39_vm1, %v2804_v51, 0 }
   0x4   :  { %v3202_v4 = vand.u32 4294901760, %v41_v3  ;;  %3138 = vset.pattern.permute.xlu0 %v3148_v29  ;;  %v3292_v54 = vand.u32 4294901760, %v952_v52  ;;  %s3149_s1 = smov 16   ;;  %vm2764_vm5 = vcmask 130048   ;;  %vm2778_vm6 = vcmask 15360  }
   0x5   :  { %v566_v34 = vsub.f32 %v497_v32, %v3258_v33 }
   0x6   :  { %1404 = vrot.lane.b32.xlu0 %v3183_v0, %s3143_s0  ;;  %25 = vrot.lane.b32.xlu1 %v3183_v0, %s3144_s22  ;;  %v110_v5 = vsub.f32 %v41_v3, %v3202_v4  ;;  %v1021_v57 = vsub.f32 %v952_v52, %v3292_v54 }
   0x7   :  { %v567_v35 = vand.u32 4294901760, %v566_v34 }
   0x8   :  { %v111_v6 = vand.u32 4294901760, %v110_v5  ;;  %v1022_v60 = vand.u32 4294901760, %v1021_v57 }
   0x9   :  { %v568_v36 = vsub.f32 %v566_v34, %v567_v35 }
   0xa   :  { %28 = vrot.lane.b32.xlu0 %v3183_v0, %s3145_s23  ;;  %31 = vrot.lane.b32.xlu1 %v3183_v0, %s3146_s24  ;;  %v112_v9 = vsub.f32 %v110_v5, %v111_v6  ;;  %v1023_v63 = vsub.f32 %v1021_v57, %v1022_v60 }
   0xb   :  { %v569_v39 = vand.u32 4294901760, %v568_v36 }
   0xc   :  { %v113_v14 = vand.u32 4294901760, %v112_v9 }
  0x74   :  { %v1402_v7 = vpop.permute.xlu0 %1401  ;;  %v1408_v8 = vpop.permute.xlu1 %1407 }
  0x78   :  { %v1405_v10 = vpop.permute.xlu0 %1404  ;;  %v26_v11 = vpop.permute.xlu1 %25 }
  0x79   :  { %v1410_v12 = vsel %vm34_vm2, %v1402_v7, %v1405_v10 }
  0x7a   :  { %v1411_v13 = vsel %vm36_vm3, %v1410_v12, %v1408_v8 }
  0x7b   :  { %2310 = vrot.lane.b32.xlu1 %v1411_v13, %s3147_s27  ;;  %v1413_v15 = vand.u32 4294901760, %v1411_v13  ;;  %1860 = vrot.lane.b32.xlu0 %v1411_v13, %s3144_s22 }
  0x7c   :  { %v29_v16 = vpop.permute.xlu0 %28  ;;  %v32_v17 = vpop.permute.xlu1 %31 }
  0x7d   :  { %v1490_v18 = vsub.f32 %v1411_v13, %v1413_v15  ;;  %v35_v19 = vsel %vm34_vm2, %v26_v11, %v29_v16  ;;  %2968 = vmatpush3.msra.mxu1 %v1413_v15 }
  0x7e   :  { %v37_v20 = vsel %vm36_vm3, %v35_v19, %v32_v17  ;;  %2970 = vmatmul.mubr.f32.vlgmr.msra.gmra.mrb[0].mxu1 %v113_v14  ;;  %2972 = vmatprep.subr.mxu1 %v3139_v1 }
  0x7f   :  { %v44_v21 = vand.u32 4294901760, %v37_v20  ;;  %493 = vrot.lane.b32.xlu0 %v37_v20, %s3144_s22  ;;  %v1491_v22 = vand.u32 4294901760, %v1490_v18  ;;  %2974 = vmatprep.mubr.msk.f32.mxu1 %vm3140_vm0, %v3139_v1 }
  0x80   :  { %948 = vrot.lane.b32.xlu1 %v37_v20, %s3147_s27 }
  0x81   :  { %v121_v23 = vsub.f32 %v37_v20, %v44_v21  ;;  %v1492_v24 = vsub.f32 %v1490_v18, %v1491_v22  ;;  %2878 = vmatpush3.msra.mxu0 %v44_v21 }
  0x82   :  { %2880 = vmatmul.mubr.f32.vlgmr.msra.gmra.mrb[0].mxu0 %v113_v14  ;;  %2882 = vmatprep.subr.mxu0 %v3139_v1 }
  0x83   :  { %v1493_v25 = vand.u32 4294901760, %v1492_v24  ;;  %v122_v26 = vand.u32 4294901760, %v121_v23  ;;  %2884 = vmatprep.mubr.msk.f32.mxu0 %vm3140_vm0, %v3139_v1  ;;  %21 = vperm.xlu0 %3138, %v18_v30  }
  0x85   :  { %2973 = vmatpush3.msra.mxu1 %v1493_v25  ;;  %v123_v27 = vsub.f32 %v121_v23, %v122_v26 }
  0x86   :  { %2975 = vmatmul.mubr.f32.vlgmr.msra.gmra.mrb[0].mxu1 %v3202_v4  ;;  %2977 = vmatprep.subr.mxu1 %v3139_v1 }
  0x87   :  { %2978 = vmatpush3.msra.mxu1 %v1490_v18  ;;  %2979 = vmatprep.mubr.msk.f32.mxu1 %vm3140_vm0, %v3139_v1  ;;  %v124_v28 = vand.u32 4294901760, %v123_v27 }
  0x88   :  { %2982 = vmatprep.subr.mxu1 %v3139_v1 }
  0x89   :  { %2883 = vmatpush3.msra.mxu0 %v124_v28 }
  0x8a   :  { %2885 = vmatmul.mubr.f32.vlgmr.msra.gmra.mrb[0].mxu0 %v3202_v4  ;;  %2887 = vmatprep.subr.mxu0 %v3139_v1 }
  0x8b   :  { %2888 = vmatpush3.msra.mxu0 %v121_v23  ;;  %2889 = vmatprep.mubr.msk.f32.mxu0 %vm3140_vm0, %v3139_v1 }
  0x8c   :  { %2892 = vmatprep.subr.mxu0 %v3139_v1 }
  0x8e   :  { %2980 = vmatmul.mubr.f32.vlgmr.msra.gmra.mrb[0].mxu1 %v110_v5 }
  0x8f   :  { %2983 = vmatpush3.msra.mxu1 %v1413_v15  ;;  %2984 = vmatprep.mubr.msk.f32.mxu1 %vm3140_vm0, %v3139_v1 }
  0x90   :  { %2987 = vmatprep.subr.mxu1 %v3139_v1 }
  0x92   :  { %2890 = vmatmul.mubr.f32.vlgmr.msra.gmra.mrb[0].mxu0 %v110_v5 }
  0x93   :  { %2893 = vmatpush3.msra.mxu0 %v44_v21  ;;  %2894 = vmatprep.mubr.msk.f32.mxu0 %vm3140_vm0, %v3139_v1 }
  0x94   :  { %2897 = vmatprep.subr.mxu0 %v3139_v1 }
  0x96   :  { %2985 = vmatmul.mubr.f32.vlgmr.msra.gmra.mrb[0].mxu1 %v111_v6 }
  0x97   :  { %2988 = vmatpush3.msra.mxu1 %v1491_v22  ;;  %2989 = vmatprep.mubr.msk.f32.mxu1 %vm3140_vm0, %v3139_v1 }
  0x98   :  { %2992 = vmatprep.subr.mxu1 %v3139_v1 }
  0x9a   :  { %2895 = vmatmul.mubr.f32.vlgmr.msra.gmra.mrb[0].mxu0 %v111_v6 }
  0x9b   :  { %2898 = vmatpush3.msra.mxu0 %v122_v26  ;;  %2899 = vmatprep.mubr.msk.f32.mxu0 %vm3140_vm0, %v3139_v1 }
  0x9c   :  { %2902 = vmatprep.subr.mxu0 %v3139_v1 }
  0x9e   :  { %2990 = vmatmul.mubr.f32.vlgmr.msra.gmra.mrb[0].mxu1 %v3202_v4 }
  0x9f   :  { %2993 = vmatpush3.msra.mxu1 %v1413_v15  ;;  %2994 = vmatprep.mubr.msk.f32.mxu1 %vm3140_vm0, %v3139_v1 }
  0xa0   :  { %2997 = vmatprep.subr.mxu1 %v3139_v1 }
  0xa2   :  { %2900 = vmatmul.mubr.f32.vlgmr.msra.gmra.mrb[0].mxu0 %v3202_v4  ;;  %2781 = vadd.xlane.f32.xlu0 %v2780_v37 }
  0xa3   :  { %2903 = vmatpush3.msra.mxu0 %v44_v21  ;;  %2904 = vmatprep.mubr.msk.f32.mxu0 %vm3140_vm0, %v3139_v1 }
  0xa4   :  { %2907 = vmatprep.subr.mxu0 %v3139_v1 }
  0xa6   :  { %2995 = vmatmul.mubr.f32.vlgmr.msra.gmra.mrb[0].mxu1 %v3202_v4 }
  0xa7   :  { %2999 = vmatprep.mubr.msk.f32.mxu1 %vm3140_vm0, %v3139_v1 }
  0xaa   :  { %2905 = vmatmul.mubr.f32.vlgmr.msra.gmra.mrb[0].mxu0 %v3202_v4  ;;  %v1024_v4 = vand.u32 4294901760, %v1023_v63 }
  0xab   :  { %2909 = vmatprep.mubr.msk.f32.mxu0 %vm3140_vm0, %v3139_v1 }
  0xed   :  { %v1861_v38 = vpop.permute.xlu0 %1860  ;;  %v2311_v53 = vpop.permute.xlu1 %2310 }
  0xee   :  { %v1864_v40 = vand.u32 4294901760, %v1861_v38  ;;  %v2314_v56 = vand.u32 4294901760, %v2311_v53 }
  0xf0   :  { %v1941_v41 = vsub.f32 %v1861_v38, %v1864_v40  ;;  %2998 = vmatpush3.msra.mxu1 %v1864_v40  ;;  %v2391_v59 = vsub.f32 %v2311_v53, %v2314_v56 }
  0xf1   :  { %3000 = vmatmul.mubr.f32.vlgmr.msra.gmra.mrb[0].mxu1 %v569_v39  ;;  %v494_v42 = vpop.permute.xlu0 %493  ;;  %3002 = vmatprep.subr.mxu1 %v3139_v1 }
  0xf2   :  { %v1942_v43 = vand.u32 4294901760, %v1941_v41  ;;  %v500_v44 = vand.u32 4294901760, %v494_v42  ;;  %3004 = vmatprep.mubr.msk.f32.mxu1 %vm3140_vm0, %v3139_v1  ;;  %v949_v55 = vpop.permute.xlu1 %948  ;;  %v2392_v62 = vand.u32 4294901760, %v2391_v59 }
  0xf3   :  { %v955_v58 = vand.u32 4294901760, %v949_v55 }
  0xf4   :  { %v1943_v45 = vsub.f32 %v1941_v41, %v1942_v43  ;;  %v577_v46 = vsub.f32 %v494_v42, %v500_v44  ;;  %2908 = vmatpush3.msra.mxu0 %v500_v44  ;;  %v2393_v3 = vsub.f32 %v2391_v59, %v2392_v62 }
  0xf5   :  { %2910 = vmatmul.mubr.f32.vlgmr.msra.gmra.mrb[0].mxu0 %v569_v39  ;;  %2912 = vmatprep.subr.mxu0 %v3139_v1  ;;  %v1032_v61 = vsub.f32 %v949_v55, %v955_v58 }
  0xf6   :  { %v1944_v47 = vand.u32 4294901760, %v1943_v45  ;;  %v578_v48 = vand.u32 4294901760, %v577_v46  ;;  %2914 = vmatprep.mubr.msk.f32.mxu0 %vm3140_vm0, %v3139_v1  ;;  %v2394_v6 = vand.u32 4294901760, %v2393_v3 }
  0xf7   :  { %v1033_v2 = vand.u32 4294901760, %v1032_v61 }
  0xf8   :  { %v579_v49 = vsub.f32 %v577_v46, %v578_v48  ;;  %3003 = vmatpush3.msra.mxu1 %v1944_v47 }
  0xf9   :  { %3005 = vmatmul.mubr.f32.vlgmr.msra.gmra.mrb[0].mxu1 %v3258_v33  ;;  %3007 = vmatprep.subr.mxu1 %v3139_v1  ;;  %v1034_v5 = vsub.f32 %v1032_v61, %v1033_v2 }
  0xfa   :  { %v580_v50 = vand.u32 4294901760, %v579_v49  ;;  %3008 = vmatpush3.msra.mxu1 %v1941_v41  ;;  %3009 = vmatprep.mubr.msk.f32.mxu1 %vm3140_vm0, %v3139_v1 }
  0xfb   :  { %3012 = vmatprep.subr.mxu1 %v3139_v1  ;;  %v1035_v7 = vand.u32 4294901760, %v1034_v5 }
  0xfc   :  { %2913 = vmatpush3.msra.mxu0 %v580_v50 }
  0xfd   :  { %2915 = vmatmul.mubr.f32.vlgmr.msra.gmra.mrb[0].mxu0 %v3258_v33  ;;  %2917 = vmatprep.subr.mxu0 %v3139_v1 }
  0xfe   :  { %2918 = vmatpush3.msra.mxu0 %v577_v46  ;;  %2919 = vmatprep.mubr.msk.f32.mxu0 %vm3140_vm0, %v3139_v1 }
  0xff   :  { %2922 = vmatprep.subr.mxu0 %v3139_v1 }
 0x101   :  { %3010 = vmatmul.mubr.f32.vlgmr.msra.gmra.mrb[0].mxu1 %v566_v34 }
 0x102   :  { %3013 = vmatpush3.msra.mxu1 %v1864_v40  ;;  %3014 = vmatprep.mubr.msk.f32.mxu1 %vm3140_vm0, %v3139_v1  ;;  %v22_v8 = vpop.permute.xlu0 %21 }
 0x103   :  { %3017 = vmatprep.subr.mxu1 %v3139_v1 }
 0x105   :  { %2920 = vmatmul.mubr.f32.vlgmr.msra.gmra.mrb[0].mxu0 %v566_v34 }
 0x106   :  { %2923 = vmatpush3.msra.mxu0 %v500_v44  ;;  %2924 = vmatprep.mubr.msk.f32.mxu0 %vm3140_vm0, %v3139_v1 }
 0x107   :  { %2927 = vmatprep.subr.mxu0 %v3139_v1 }
 0x109   :  { %3015 = vmatmul.mubr.f32.vlgmr.msra.gmra.mrb[0].mxu1 %v567_v35 }
 0x10a   :  { %3018 = vmatpush3.msra.mxu1 %v1942_v43  ;;  %3019 = vmatprep.mubr.msk.f32.mxu1 %vm3140_vm0, %v3139_v1 }
 0x10b   :  { %3022 = vmatprep.subr.mxu1 %v3139_v1 }
 0x10d   :  { %2925 = vmatmul.mubr.f32.vlgmr.msra.gmra.mrb[0].mxu0 %v567_v35 }
 0x10e   :  { %2928 = vmatpush3.msra.mxu0 %v578_v48  ;;  %2929 = vmatprep.mubr.msk.f32.mxu0 %vm3140_vm0, %v3139_v1 }
 0x10f   :  { %2932 = vmatprep.subr.mxu0 %v3139_v1 }
 0x111   :  { %3020 = vmatmul.mubr.f32.vlgmr.msra.gmra.mrb[0].mxu1 %v3258_v33 }
 0x112   :  { %3023 = vmatpush3.msra.mxu1 %v1864_v40  ;;  %3024 = vmatprep.mubr.msk.f32.mxu1 %vm3140_vm0, %v3139_v1 }
 0x113   :  { %3027 = vmatprep.subr.mxu1 %v3139_v1 }
 0x115   :  { %2930 = vmatmul.mubr.f32.vlgmr.msra.gmra.mrb[0].mxu0 %v3258_v33 }
 0x116   :  { %2933 = vmatpush3.msra.mxu0 %v500_v44  ;;  %2934 = vmatprep.mubr.msk.f32.mxu0 %vm3140_vm0, %v3139_v1 }
 0x117   :  { %2937 = vmatprep.subr.mxu0 %v3139_v1 }
 0x119   :  { %3025 = vmatmul.mubr.f32.vlgmr.msra.gmra.mrb[0].mxu1 %v3258_v33 }
 0x11a   :  { %3028 = vmatpush3.msra.mxu1 %v2314_v56  ;;  %3029 = vmatprep.mubr.msk.f32.mxu1 %vm3140_vm0, %v3139_v1 }
 0x11b   :  { %3032 = vmatprep.subr.mxu1 %v3139_v1 }
 0x11d   :  { %2935 = vmatmul.mubr.f32.vlgmr.msra.gmra.mrb[0].mxu0 %v3258_v33 }
 0x11e   :  { %2938 = vmatpush3.msra.mxu0 %v955_v58  ;;  %2939 = vmatprep.mubr.msk.f32.mxu0 %vm3140_vm0, %v3139_v1 }
 0x11f   :  { %2942 = vmatprep.subr.mxu0 %v3139_v1 }
 0x121   :  { %3030 = vmatmul.mubr.f32.vlgmr.msra.gmra.mrb[0].mxu1 %v1024_v4 }
 0x122   :  { %3033 = vmatpush3.msra.mxu1 %v2394_v6  ;;  %3034 = vmatprep.mubr.msk.f32.mxu1 %vm3140_vm0, %v3139_v1 }
 0x123   :  { %3037 = vmatprep.subr.mxu1 %v3139_v1 }
 0x125   :  { %2940 = vmatmul.mubr.f32.vlgmr.msra.gmra.mrb[0].mxu0 %v1024_v4 }
 0x126   :  { %2943 = vmatpush3.msra.mxu0 %v1035_v7  ;;  %2944 = vmatprep.mubr.msk.f32.mxu0 %vm3140_vm0, %v3139_v1 }
 0x127   :  { %2947 = vmatprep.subr.mxu0 %v3139_v1 }
 0x129   :  { %3035 = vmatmul.mubr.f32.vlgmr.msra.gmra.mrb[0].mxu1 %v3292_v54 }
 0x12a   :  { %3038 = vmatpush3.msra.mxu1 %v2391_v59  ;;  %3039 = vmatprep.mubr.msk.f32.mxu1 %vm3140_vm0, %v3139_v1 }
 0x12b   :  { %3042 = vmatprep.subr.mxu1 %v3139_v1 }
 0x12d   :  { %2945 = vmatmul.mubr.f32.vlgmr.msra.gmra.mrb[0].mxu0 %v3292_v54 }
 0x12e   :  { %2948 = vmatpush3.msra.mxu0 %v1032_v61  ;;  %2949 = vmatprep.mubr.msk.f32.mxu0 %vm3140_vm0, %v3139_v1 }
 0x12f   :  { %2952 = vmatprep.subr.mxu0 %v3139_v1  ;;  %v2782_v15 = vpop.xlane.xlu0 %2781 }
 0x130   :  { %v2783_v16 = vmul.f32 0.03125, %v2782_v15 }
 0x131   :  { %3040 = vmatmul.mubr.f32.vlgmr.msra.gmra.mrb[0].mxu1 %v1021_v57 }
 0x132   :  { %3043 = vmatpush3.msra.mxu1 %v2314_v56  ;;  %3044 = vmatprep.mubr.msk.f32.mxu1 %vm3140_vm0, %v3139_v1  ;;  %v2784_v17 = vsub.f32 %v3183_v0, %v2783_v16 }
 0x133   :  { %3047 = vmatprep.subr.mxu1 %v3139_v1 }
 0x135   :  { %2950 = vmatmul.mubr.f32.vlgmr.msra.gmra.mrb[0].mxu0 %v1021_v57 }
 0x136   :  { %2953 = vmatpush3.msra.mxu0 %v955_v58  ;;  %2954 = vmatprep.mubr.msk.f32.mxu0 %vm3140_vm0, %v3139_v1 }
 0x137   :  { %2957 = vmatprep.subr.mxu0 %v3139_v1 }
 0x139   :  { %3045 = vmatmul.mubr.f32.vlgmr.msra.gmra.mrb[0].mxu1 %v1022_v60 }
 0x13a   :  { %3048 = vmatpush3.msra.mxu1 %v2392_v62  ;;  %3049 = vmatprep.mubr.msk.f32.mxu1 %vm3140_vm0, %v3139_v1 }
 0x13b   :  { %3052 = vmatprep.subr.mxu1 %v3139_v1 }
 0x13d   :  { %2955 = vmatmul.mubr.f32.vlgmr.msra.gmra.mrb[0].mxu0 %v1022_v60 }
 0x13e   :  { %2958 = vmatpush3.msra.mxu0 %v1033_v2  ;;  %2959 = vmatprep.mubr.msk.f32.mxu0 %vm3140_vm0, %v3139_v1 }
 0x13f   :  { %2962 = vmatprep.subr.mxu0 %v3139_v1 }
 0x141   :  { %3050 = vmatmul.mubr.f32.vlgmr.msra.gmra.mrb[0].mxu1 %v3292_v54 }
 0x142   :  { %3053 = vmatpush3.msra.mxu1 %v2314_v56  ;;  %3054 = vmatprep.mubr.msk.f32.mxu1 %vm3140_vm0, %v3139_v1 }
 0x145   :  { %2960 = vmatmul.mubr.f32.vlgmr.msra.gmra.mrb[0].mxu0 %v3292_v54 }
 0x146   :  { %2963 = vmatpush3.msra.mxu0 %v955_v58  ;;  %2964 = vmatprep.mubr.msk.f32.mxu0 %vm3140_vm0, %v3139_v1  ;;  %v2785_v1 = vmul.f32 %v2784_v17, %v2784_v17 }
 0x148   :  { %v2786_v21 = vsel %vm2766_vm4, %v2785_v1, 0.0 }
 0x149   :  { %3055 = vmatmul.mubr.f32.vlgmr.msra.gmra.mrb[0].mxu1 %v3292_v54 }
 0x14d   :  { %2965 = vmatmul.mubr.f32.vlgmr.msra.gmra.mrb[0].mxu0 %v3292_v54 }
 0x21c   :  { %v2755_v9 = vpop.f32.mrb[0].mxu1 }
 0x21d   :  { %v3058_v10 = vadd.f32 %v2755_v9, %v22_v8  ;;  %v3056_v11 = vpop.f32.mrb[1].mxu1 }
 0x21f   :  { %2761 = vrot.lane.b32.xlu1 %v3058_v10, %s3149_s1 }
 0x220   :  { %v1396_v12 = vpop.f32.mrb[0].mxu0 }
 0x221   :  { %v3057_v13 = vadd.f32 %v1396_v12, %v22_v8  ;;  %v2966_v14 = vpop.f32.mrb[1].mxu0 }
 0x291   :  { %v2762_v18 = vpop.permute.xlu1 %2761 }
 0x292   :  { %v2765_v19 = vsel %vm2764_vm5, %v3057_v13, %v2762_v18 }
 0x293   :  { %2767 = vst.msk [vmem:[%s3367_s3] sm:$0xff] %vm2766_vm4, %v2765_v19  ;;  %v2768_v20 = vsel %vm2766_vm4, %v2765_v19, 0.0 }
 0x294   :  { %2769 = vadd.xlane.f32.xlu1 %v2768_v20 }
 0x298   :  { %2787 = vadd.xlane.f32.xlu1 %v2786_v21 }
 0x321   :  { %v2770_v22 = vpop.xlane.xlu1 %2769 }
 0x322   :  { %v2771_v23 = vmul.f32 0.03125, %v2770_v22 }
 0x324   :  { %v2772_v24 = vsub.f32 %v2765_v19, %v2771_v23 }
 0x325   :  { %v2788_v0 = vpop.xlane.xlu1 %2787 }
 0x326   :  { %v2789_v25 = vsel %vm34_vm2, %v2782_v15, %v2788_v0  ;;  %v2773_v26 = vmul.f32 %v2772_v24, %v2772_v24 }
 0x327   :  { %2790 = vst.msk [vmem:[%s3368_s5] sm:$0xff] %vm2778_vm6, %v2789_v25 }
 0x328   :  { %v2774_v27 = vsel %vm2766_vm4, %v2773_v26, 0.0 }
 0x329   :  { %2775 = vadd.xlane.f32.xlu0 %v2774_v27 }
 0x3b6   :  { %v2776_v28 = vpop.xlane.xlu0 %2775 }
 0x3b7   :  { %v2777_v29 = vsel %vm34_vm2, %v2770_v22, %v2776_v28 }
 0x3b8   :  { %2779 = vst.msk [vmem:[%s3369_s4] sm:$0xff] %vm2778_vm6, %v2777_v29 }

// kernel: skip2_conv_norm_acti_1d.4
= control target key start
LH: loop header
LB: loop body
LE: loop exit
PB: predicated region body
PF: predicated region fallthrough
CT: control target
= control target key end

     0   :  { %v3144_v0 = vmov 0   ;;  %v3145_v6 = vmov 0.0   ;;  %vm3146_vm0 = vmmov 0   ;;  %s3150_s27 = smov 113   ;;  %s3151_s28 = smov 127   ;;  %vm59_vm1 = vcmask 64512   ;;  %s3374_s1 = inlined_call_operand.vmem [shape: f32[8,1], index: 1, kind: input, shape index: {}]   ;;  %s3375_s2 = inlined_call_operand.vmem [shape: f32[8,1], index: 2, kind: input, shape index: {}]   ;;  %s3376_s0 = inlined_call_operand.vmem [shape: f32[8,32], index: 0, kind: input, shape index: {}]   ;;  %s3377_s3 = inlined_call_operand.vmem [shape: f32[3,8,8], index: 3, kind: input, shape index: {}]   ;;  %s3378_s4 = inlined_call_operand.vmem [shape: f32[8,1], index: 4, kind: input, shape index: {}]   ;;  %s3379_s5 = inlined_call_operand.vmem [shape: f32[8,32], index: 5, kind: output, shape index: {0}]   ;;  %s3380_s6 = inlined_call_operand.vmem [shape: f32[1,8,2], index: 6, kind: output, shape index: {1}]  }
   0x1   :  { %3143 = vset.pattern.permute.xlu0 %v3144_v0  ;;  %v23_v1 = vld [vmem:[%s3374_s1] sm:$0xff]  ;;  %2972 = vmatprep.subr.mxu1 %v3145_v6  ;;  %s3147_s1 = smov 115   ;;  %s3152_s29 = smov 3   ;;  %vm54_vm2 = vcmask 7168   ;;  %vm56_vm3 = vcmask 138240   ;;  %v2808_v38 = vld [vmem:[%s3377_s3 + $0x8] sm:$0xff] }
   0x2   :  { %26 = vperm.xlu0 %3143, %v23_v1   ;;  %v30_v2 = vld [vmem:[%s3375_s2] sm:$0xff]  ;;  %2882 = vmatprep.subr.mxu0 %v3145_v6  ;;  %s3148_s2 = smov 111   ;;  %s3153_s8 = smov 126   ;;  %v517_v39 = vsel %vm59_vm1, %v2808_v38, 0  ;;  %v2809_v57 = vld [vmem:[%s3377_s3 + $0x10] sm:$0xff]  ;;  %vm2784_vm4 = vcmask 130048  }
   0x3   :  { %v22_v4 = vld [vmem:[%s3376_s0] sm:$0xff]  ;;  %2974 = vmatprep.mubr.msk.f32.mxu1 %vm3146_vm0, %v3145_v6  ;;  %2884 = vmatprep.mubr.msk.f32.mxu0 %vm3146_vm0, %v3145_v6  ;;  %s3149_s0 = smov 1   ;;  %v3273_v40 = vand.u32 4294901760, %v517_v39  ;;  %v972_v58 = vsel %vm59_vm1, %v2809_v57, 0  ;;  %vm2786_vm5 = vcmask 261120   ;;  %vm2798_vm6 = vcmask 15360  }
   0x4   :  { %v58_v10 = vld [vmem:[%s3377_s3] sm:$0xff]  ;;  %v3305_v60 = vand.u32 4294901760, %v972_v58  ;;  %s3154_s3 = smov 16  }
   0x5   :  { %v61_v11 = vsel %vm59_vm1, %v58_v10, 0  ;;  %v38_v34 = vld [vmem:[%s3378_s4] sm:$0xff]  ;;  %v586_v41 = vsub.f32 %v517_v39, %v3273_v40 }
   0x6   :  { %33 = vperm.xlu0 %3143, %v30_v2   ;;  %v3210_v12 = vand.u32 4294901760, %v61_v11  ;;  %v1041_v62 = vsub.f32 %v972_v58, %v3305_v60 }
   0x7   :  { %v587_v42 = vand.u32 4294901760, %v586_v41 }
   0x8   :  { %v130_v13 = vsub.f32 %v61_v11, %v3210_v12  ;;  %v1042_v1 = vand.u32 4294901760, %v1041_v62 }
   0x9   :  { %v588_v43 = vsub.f32 %v586_v41, %v587_v42 }
   0xa   :  { %v3213_v14 = vand.u32 4294901760, %v130_v13 }
   0xb   :  { %v589_v45 = vand.u32 4294901760, %v588_v43 }
   0xc   :  { %v132_v16 = vsub.f32 %v130_v13, %v3213_v14 }
   0xe   :  { %v133_v21 = vand.u32 4294901760, %v132_v16 }
  0x81   :  { %v27_v3 = vpop.permute.xlu0 %26 }
  0x82   :  { %v29_v5 = vmul.f32 %v27_v3, %v22_v4  ;;  %v1043_v4 = vsub.f32 %v1041_v62, %v1042_v1 }
  0x85   :  { %v34_v7 = vpop.permute.xlu0 %33 }
  0x86   :  { %v36_v8 = vadd.f32 %v34_v7, %v29_v5 }
  0x88   :  { %v37_v9 = vmax.f32 %v36_v8, 0.0  ;;  %v1044_v8 = vand.u32 4294901760, %v1043_v4 }
  0x8a   :  { %1427 = vrot.lane.b32.xlu0 %v37_v9, %s3147_s1  ;;  %1421 = vrot.lane.b32.xlu1 %v37_v9, %s3148_s2 }
  0x8e   :  { %48 = vrot.lane.b32.xlu0 %v37_v9, %s3149_s0  ;;  %1424 = vrot.lane.b32.xlu1 %v37_v9, %s3150_s27 }
  0x92   :  { %45 = vrot.lane.b32.xlu1 %v37_v9, %s3151_s28 }
  0x96   :  { %51 = vrot.lane.b32.xlu1 %v37_v9, %s3152_s29 }
  0xfc   :  { %v1422_v15 = vpop.permute.xlu1 %1421  ;;  %v1428_v18 = vpop.permute.xlu0 %1427 }
 0x100   :  { %v1425_v17 = vpop.permute.xlu1 %1424  ;;  %v49_v25 = vpop.permute.xlu0 %48 }
 0x101   :  { %v1430_v19 = vsel %vm54_vm2, %v1422_v15, %v1425_v17 }
 0x102   :  { %v1431_v20 = vsel %vm56_vm3, %v1430_v19, %v1428_v18 }
 0x103   :  { %2330 = vrot.lane.b32.xlu1 %v1431_v20, %s3153_s8  ;;  %v1433_v22 = vand.u32 4294901760, %v1431_v20  ;;  %1880 = vrot.lane.b32.xlu0 %v1431_v20, %s3151_s28 }
 0x104   :  { %v46_v23 = vpop.permute.xlu1 %45 }
 0x105   :  { %v1510_v24 = vsub.f32 %v1431_v20, %v1433_v22  ;;  %2973 = vmatpush3.msra.mxu1 %v1433_v22  ;;  %v55_v27 = vsel %vm54_vm2, %v46_v23, %v49_v25 }
 0x106   :  { %2975 = vmatmul.mubr.f32.vlgmr.msra.gmra.mrb[0].mxu1 %v133_v21  ;;  %2977 = vmatprep.subr.mxu1 %v3145_v6 }
 0x107   :  { %v1511_v26 = vand.u32 4294901760, %v1510_v24  ;;  %2979 = vmatprep.mubr.msk.f32.mxu1 %vm3146_vm0, %v3145_v6 }
 0x108   :  { %v52_v28 = vpop.permute.xlu1 %51 }
 0x109   :  { %v57_v29 = vsel %vm56_vm3, %v55_v27, %v52_v28  ;;  %v1512_v30 = vsub.f32 %v1510_v24, %v1511_v26 }
 0x10a   :  { %v64_v31 = vand.u32 4294901760, %v57_v29  ;;  %968 = vrot.lane.b32.xlu1 %v57_v29, %s3153_s8  ;;  %513 = vrot.lane.b32.xlu0 %v57_v29, %s3151_s28 }
 0x10b   :  { %v1513_v32 = vand.u32 4294901760, %v1512_v30 }
 0x10c   :  { %v141_v33 = vsub.f32 %v57_v29, %v64_v31  ;;  %2883 = vmatpush3.msra.mxu0 %v64_v31 }
 0x10d   :  { %2885 = vmatmul.mubr.f32.vlgmr.msra.gmra.mrb[0].mxu0 %v133_v21  ;;  %2978 = vmatpush3.msra.mxu1 %v1513_v32 }
 0x10e   :  { %2980 = vmatmul.mubr.f32.vlgmr.msra.gmra.mrb[0].mxu1 %v3210_v12  ;;  %2982 = vmatprep.subr.mxu1 %v3145_v6  ;;  %v142_v35 = vand.u32 4294901760, %v141_v33 }
 0x10f   :  { %41 = vperm.xlu0 %3143, %v38_v34   ;;  %2983 = vmatpush3.msra.mxu1 %v1510_v24 }
 0x110   :  { %2887 = vmatprep.subr.mxu0 %v3145_v6  ;;  %v143_v36 = vsub.f32 %v141_v33, %v142_v35  ;;  %2889 = vmatprep.mubr.msk.f32.mxu0 %vm3146_vm0, %v3145_v6 }
 0x111   :  { %2984 = vmatprep.mubr.msk.f32.mxu1 %vm3146_vm0, %v3145_v6  ;;  %2987 = vmatprep.subr.mxu1 %v3145_v6 }
 0x112   :  { %v144_v37 = vand.u32 4294901760, %v143_v36 }
 0x114   :  { %2888 = vmatpush3.msra.mxu0 %v144_v37 }
 0x115   :  { %2890 = vmatmul.mubr.f32.vlgmr.msra.gmra.mrb[0].mxu0 %v3210_v12  ;;  %2892 = vmatprep.subr.mxu0 %v3145_v6 }
 0x116   :  { %2893 = vmatpush3.msra.mxu0 %v141_v33  ;;  %2985 = vmatmul.mubr.f32.vlgmr.msra.gmra.mrb[0].mxu1 %v130_v13 }
 0x117   :  { %2988 = vmatpush3.msra.mxu1 %v1433_v22  ;;  %2894 = vmatprep.mubr.msk.f32.mxu0 %vm3146_vm0, %v3145_v6 }
 0x118   :  { %2897 = vmatprep.subr.mxu0 %v3145_v6  ;;  %2989 = vmatprep.mubr.msk.f32.mxu1 %vm3146_vm0, %v3145_v6 }
 0x119   :  { %2992 = vmatprep.subr.mxu1 %v3145_v6 }
 0x11d   :  { %2895 = vmatmul.mubr.f32.vlgmr.msra.gmra.mrb[0].mxu0 %v130_v13 }
 0x11e   :  { %2898 = vmatpush3.msra.mxu0 %v64_v31  ;;  %2990 = vmatmul.mubr.f32.vlgmr.msra.gmra.mrb[0].mxu1 %v3213_v14 }
 0x11f   :  { %2993 = vmatpush3.msra.mxu1 %v1511_v26  ;;  %2899 = vmatprep.mubr.msk.f32.mxu0 %vm3146_vm0, %v3145_v6 }
 0x120   :  { %2902 = vmatprep.subr.mxu0 %v3145_v6  ;;  %2994 = vmatprep.mubr.msk.f32.mxu1 %vm3146_vm0, %v3145_v6 }
 0x121   :  { %2997 = vmatprep.subr.mxu1 %v3145_v6 }
 0x125   :  { %2900 = vmatmul.mubr.f32.vlgmr.msra.gmra.mrb[0].mxu0 %v3213_v14 }
 0x126   :  { %2903 = vmatpush3.msra.mxu0 %v142_v35  ;;  %2995 = vmatmul.mubr.f32.vlgmr.msra.gmra.mrb[0].mxu1 %v3210_v12 }
 0x127   :  { %2998 = vmatpush3.msra.mxu1 %v1433_v22  ;;  %2904 = vmatprep.mubr.msk.f32.mxu0 %vm3146_vm0, %v3145_v6 }
 0x128   :  { %2907 = vmatprep.subr.mxu0 %v3145_v6  ;;  %2999 = vmatprep.mubr.msk.f32.mxu1 %vm3146_vm0, %v3145_v6 }
 0x129   :  { %3002 = vmatprep.subr.mxu1 %v3145_v6 }
 0x12d   :  { %2905 = vmatmul.mubr.f32.vlgmr.msra.gmra.mrb[0].mxu0 %v3210_v12 }
 0x12e   :  { %2908 = vmatpush3.msra.mxu0 %v64_v31  ;;  %3000 = vmatmul.mubr.f32.vlgmr.msra.gmra.mrb[0].mxu1 %v3210_v12 }
 0x12f   :  { %2909 = vmatprep.mubr.msk.f32.mxu0 %vm3146_vm0, %v3145_v6  ;;  %3004 = vmatprep.mubr.msk.f32.mxu1 %vm3146_vm0, %v3145_v6 }
 0x130   :  { %2912 = vmatprep.subr.mxu0 %v3145_v6 }
 0x135   :  { %2910 = vmatmul.mubr.f32.vlgmr.msra.gmra.mrb[0].mxu0 %v3210_v12 }
 0x136   :  { %2914 = vmatprep.mubr.msk.f32.mxu0 %vm3146_vm0, %v3145_v6 }
 0x175   :  { %v1881_v44 = vpop.permute.xlu0 %1880  ;;  %v2331_v59 = vpop.permute.xlu1 %2330 }
 0x176   :  { %v1884_v46 = vand.u32 4294901760, %v1881_v44  ;;  %v3307_v61 = vand.u32 4294901760, %v2331_v59 }
 0x178   :  { %v1961_v47 = vsub.f32 %v1881_v44, %v1884_v46  ;;  %3003 = vmatpush3.msra.mxu1 %v1884_v46  ;;  %v2411_v63 = vsub.f32 %v2331_v59, %v3307_v61 }
 0x179   :  { %3005 = vmatmul.mubr.f32.vlgmr.msra.gmra.mrb[0].mxu1 %v589_v45  ;;  %3007 = vmatprep.subr.mxu1 %v3145_v6 }
 0x17a   :  { %v1962_v48 = vand.u32 4294901760, %v1961_v47  ;;  %3009 = vmatprep.mubr.msk.f32.mxu1 %vm3146_vm0, %v3145_v6  ;;  %v2412_v3 = vand.u32 4294901760, %v2411_v63 }
 0x17c   :  { %v1963_v49 = vsub.f32 %v1961_v47, %v1962_v48  ;;  %v514_v50 = vpop.permute.xlu0 %513  ;;  %v969_v0 = vpop.permute.xlu1 %968  ;;  %v2413_v7 = vsub.f32 %v2411_v63, %v2412_v3 }
 0x17d   :  { %v520_v51 = vand.u32 4294901760, %v514_v50  ;;  %v975_v2 = vand.u32 4294901760, %v969_v0 }
 0x17e   :  { %v1964_v52 = vand.u32 4294901760, %v1963_v49  ;;  %v2414_v10 = vand.u32 4294901760, %v2413_v7 }
 0x17f   :  { %v597_v53 = vsub.f32 %v514_v50, %v520_v51  ;;  %2913 = vmatpush3.msra.mxu0 %v520_v51  ;;  %v1052_v5 = vsub.f32 %v969_v0, %v975_v2 }
 0x180   :  { %2915 = vmatmul.mubr.f32.vlgmr.msra.gmra.mrb[0].mxu0 %v589_v45  ;;  %3008 = vmatpush3.msra.mxu1 %v1964_v52 }
 0x181   :  { %v598_v54 = vand.u32 4294901760, %v597_v53  ;;  %3010 = vmatmul.mubr.f32.vlgmr.msra.gmra.mrb[0].mxu1 %v3273_v40  ;;  %3012 = vmatprep.subr.mxu1 %v3145_v6  ;;  %v1053_v9 = vand.u32 4294901760, %v1052_v5 }
 0x182   :  { %3013 = vmatpush3.msra.mxu1 %v1961_v47  ;;  %2917 = vmatprep.subr.mxu0 %v3145_v6 }
 0x183   :  { %v599_v55 = vsub.f32 %v597_v53, %v598_v54  ;;  %2919 = vmatprep.mubr.msk.f32.mxu0 %vm3146_vm0, %v3145_v6  ;;  %3014 = vmatprep.mubr.msk.f32.mxu1 %vm3146_vm0, %v3145_v6  ;;  %v1054_v11 = vsub.f32 %v1052_v5, %v1053_v9 }
 0x184   :  { %3017 = vmatprep.subr.mxu1 %v3145_v6 }
 0x185   :  { %v600_v56 = vand.u32 4294901760, %v599_v55  ;;  %v1055_v12 = vand.u32 4294901760, %v1054_v11 }
 0x187   :  { %2918 = vmatpush3.msra.mxu0 %v600_v56 }
 0x188   :  { %2920 = vmatmul.mubr.f32.vlgmr.msra.gmra.mrb[0].mxu0 %v3273_v40  ;;  %2922 = vmatprep.subr.mxu0 %v3145_v6 }
 0x189   :  { %2923 = vmatpush3.msra.mxu0 %v597_v53  ;;  %3015 = vmatmul.mubr.f32.vlgmr.msra.gmra.mrb[0].mxu1 %v586_v41 }
 0x18a   :  { %3018 = vmatpush3.msra.mxu1 %v1884_v46  ;;  %2924 = vmatprep.mubr.msk.f32.mxu0 %vm3146_vm0, %v3145_v6 }
 0x18b   :  { %2927 = vmatprep.subr.mxu0 %v3145_v6  ;;  %3019 = vmatprep.mubr.msk.f32.mxu1 %vm3146_vm0, %v3145_v6 }
 0x18c   :  { %3022 = vmatprep.subr.mxu1 %v3145_v6 }
 0x18e   :  { %v42_v13 = vpop.permute.xlu0 %41 }
 0x190   :  { %2925 = vmatmul.mubr.f32.vlgmr.msra.gmra.mrb[0].mxu0 %v586_v41 }
 0x191   :  { %2928 = vmatpush3.msra.mxu0 %v520_v51  ;;  %3020 = vmatmul.mubr.f32.vlgmr.msra.gmra.mrb[0].mxu1 %v587_v42 }
 0x192   :  { %3023 = vmatpush3.msra.mxu1 %v1962_v48  ;;  %2929 = vmatprep.mubr.msk.f32.mxu0 %vm3146_vm0, %v3145_v6 }
 0x193   :  { %2932 = vmatprep.subr.mxu0 %v3145_v6  ;;  %3024 = vmatprep.mubr.msk.f32.mxu1 %vm3146_vm0, %v3145_v6 }
 0x194   :  { %3027 = vmatprep.subr.mxu1 %v3145_v6 }
 0x198   :  { %2930 = vmatmul.mubr.f32.vlgmr.msra.gmra.mrb[0].mxu0 %v587_v42 }
 0x199   :  { %2933 = vmatpush3.msra.mxu0 %v598_v54  ;;  %3025 = vmatmul.mubr.f32.vlgmr.msra.gmra.mrb[0].mxu1 %v3273_v40 }
 0x19a   :  { %3028 = vmatpush3.msra.mxu1 %v1884_v46  ;;  %2934 = vmatprep.mubr.msk.f32.mxu0 %vm3146_vm0, %v3145_v6 }
 0x19b   :  { %2937 = vmatprep.subr.mxu0 %v3145_v6  ;;  %3029 = vmatprep.mubr.msk.f32.mxu1 %vm3146_vm0, %v3145_v6 }
 0x19c   :  { %3032 = vmatprep.subr.mxu1 %v3145_v6 }
 0x1a0   :  { %2935 = vmatmul.mubr.f32.vlgmr.msra.gmra.mrb[0].mxu0 %v3273_v40 }
 0x1a1   :  { %2938 = vmatpush3.msra.mxu0 %v520_v51  ;;  %3030 = vmatmul.mubr.f32.vlgmr.msra.gmra.mrb[0].mxu1 %v3273_v40 }
 0x1a2   :  { %3033 = vmatpush3.msra.mxu1 %v3307_v61  ;;  %2939 = vmatprep.mubr.msk.f32.mxu0 %vm3146_vm0, %v3145_v6 }
 0x1a3   :  { %2942 = vmatprep.subr.mxu0 %v3145_v6  ;;  %3034 = vmatprep.mubr.msk.f32.mxu1 %vm3146_vm0, %v3145_v6 }
 0x1a4   :  { %3037 = vmatprep.subr.mxu1 %v3145_v6 }
 0x1a8   :  { %2940 = vmatmul.mubr.f32.vlgmr.msra.gmra.mrb[0].mxu0 %v3273_v40 }
 0x1a9   :  { %2943 = vmatpush3.msra.mxu0 %v975_v2  ;;  %3035 = vmatmul.mubr.f32.vlgmr.msra.gmra.mrb[0].mxu1 %v1044_v8 }
 0x1aa   :  { %3038 = vmatpush3.msra.mxu1 %v2414_v10  ;;  %2944 = vmatprep.mubr.msk.f32.mxu0 %vm3146_vm0, %v3145_v6 }
 0x1ab   :  { %2947 = vmatprep.subr.mxu0 %v3145_v6  ;;  %3039 = vmatprep.mubr.msk.f32.mxu1 %vm3146_vm0, %v3145_v6 }
 0x1ac   :  { %3042 = vmatprep.subr.mxu1 %v3145_v6 }
 0x1b0   :  { %2945 = vmatmul.mubr.f32.vlgmr.msra.gmra.mrb[0].mxu0 %v1044_v8 }
 0x1b1   :  { %2948 = vmatpush3.msra.mxu0 %v1055_v12  ;;  %3040 = vmatmul.mubr.f32.vlgmr.msra.gmra.mrb[0].mxu1 %v3305_v60 }
 0x1b2   :  { %3043 = vmatpush3.msra.mxu1 %v2411_v63  ;;  %2949 = vmatprep.mubr.msk.f32.mxu0 %vm3146_vm0, %v3145_v6 }
 0x1b3   :  { %2952 = vmatprep.subr.mxu0 %v3145_v6  ;;  %3044 = vmatprep.mubr.msk.f32.mxu1 %vm3146_vm0, %v3145_v6 }
 0x1b4   :  { %3047 = vmatprep.subr.mxu1 %v3145_v6 }
 0x1b8   :  { %2950 = vmatmul.mubr.f32.vlgmr.msra.gmra.mrb[0].mxu0 %v3305_v60 }
 0x1b9   :  { %2953 = vmatpush3.msra.mxu0 %v1052_v5  ;;  %3045 = vmatmul.mubr.f32.vlgmr.msra.gmra.mrb[0].mxu1 %v1041_v62 }
 0x1ba   :  { %3048 = vmatpush3.msra.mxu1 %v3307_v61  ;;  %2954 = vmatprep.mubr.msk.f32.mxu0 %vm3146_vm0, %v3145_v6 }
 0x1bb   :  { %2957 = vmatprep.subr.mxu0 %v3145_v6  ;;  %3049 = vmatprep.mubr.msk.f32.mxu1 %vm3146_vm0, %v3145_v6 }
 0x1bc   :  { %3052 = vmatprep.subr.mxu1 %v3145_v6 }
 0x1c0   :  { %2955 = vmatmul.mubr.f32.vlgmr.msra.gmra.mrb[0].mxu0 %v1041_v62 }
 0x1c1   :  { %2958 = vmatpush3.msra.mxu0 %v975_v2  ;;  %3050 = vmatmul.mubr.f32.vlgmr.msra.gmra.mrb[0].mxu1 %v1042_v1 }
 0x1c2   :  { %3053 = vmatpush3.msra.mxu1 %v2412_v3  ;;  %2959 = vmatprep.mubr.msk.f32.mxu0 %vm3146_vm0, %v3145_v6 }
 0x1c3   :  { %2962 = vmatprep.subr.mxu0 %v3145_v6  ;;  %3054 = vmatprep.mubr.msk.f32.mxu1 %vm3146_vm0, %v3145_v6 }
 0x1c4   :  { %3057 = vmatprep.subr.mxu1 %v3145_v6 }
 0x1c8   :  { %2960 = vmatmul.mubr.f32.vlgmr.msra.gmra.mrb[0].mxu0 %v1042_v1 }
 0x1c9   :  { %2963 = vmatpush3.msra.mxu0 %v1053_v9  ;;  %3055 = vmatmul.mubr.f32.vlgmr.msra.gmra.mrb[0].mxu1 %v3305_v60 }
 0x1ca   :  { %3058 = vmatpush3.msra.mxu1 %v3307_v61  ;;  %2964 = vmatprep.mubr.msk.f32.mxu0 %vm3146_vm0, %v3145_v6 }
 0x1cb   :  { %2967 = vmatprep.subr.mxu0 %v3145_v6  ;;  %3059 = vmatprep.mubr.msk.f32.mxu1 %vm3146_vm0, %v3145_v6 }
 0x1d0   :  { %2965 = vmatmul.mubr.f32.vlgmr.msra.gmra.mrb[0].mxu0 %v3305_v60 }
 0x1d1   :  { %2968 = vmatpush3.msra.mxu0 %v975_v2  ;;  %3060 = vmatmul.mubr.f32.vlgmr.msra.gmra.mrb[0].mxu1 %v3305_v60 }
 0x1d2   :  { %2969 = vmatprep.mubr.msk.f32.mxu0 %vm3146_vm0, %v3145_v6 }
 0x1d8   :  { %2970 = vmatmul.mubr.f32.vlgmr.msra.gmra.mrb[0].mxu0 %v3305_v60 }
 0x2a4   :  { %v2775_v14 = vpop.f32.mrb[0].mxu1 }
 0x2a5   :  { %v3063_v15 = vadd.f32 %v2775_v14, %v42_v13  ;;  %v3061_v16 = vpop.f32.mrb[1].mxu1 }
 0x2a7   :  { %2781 = vrot.lane.b32.xlu1 %v3063_v15, %s3154_s3 }
 0x2ab   :  { %v1416_v17 = vpop.f32.mrb[0].mxu0 }
 0x2ac   :  { %v2971_v18 = vpop.f32.mrb[1].mxu0  ;;  %v3062_v19 = vadd.f32 %v1416_v17, %v42_v13 }
 0x319   :  { %v2782_v20 = vpop.permute.xlu1 %2781 }
 0x31a   :  { %v2785_v21 = vsel %vm2784_vm4, %v3062_v19, %v2782_v20 }
 0x31b   :  { %v2788_v22 = vsel %vm2786_vm5, %v2785_v21, 0.0  ;;  %2787 = vst.msk [vmem:[%s3379_s5] sm:$0xff] %vm2786_vm5, %v2785_v21 }
 0x31c   :  { %2789 = vadd.xlane.f32.xlu0 %v2788_v22 }
 0x3a9   :  { %v2790_v6 = vpop.xlane.xlu0 %2789 }
 0x3aa   :  { %v2791_v23 = vmul.f32 0.03125, %v2790_v6 }
 0x3ac   :  { %v2792_v24 = vsub.f32 %v2785_v21, %v2791_v23 }
 0x3ae   :  { %v2793_v25 = vmul.f32 %v2792_v24, %v2792_v24 }
 0x3b0   :  { %v2794_v26 = vsel %vm2786_vm5, %v2793_v25, 0.0 }
 0x3b1   :  { %2795 = vadd.xlane.f32.xlu1 %v2794_v26 }
 0x43e   :  { %v2796_v27 = vpop.xlane.xlu1 %2795 }
 0x43f   :  { %v2797_v28 = vsel %vm54_vm2, %v2790_v6, %v2796_v27 }
 0x440   :  { %2799 = vst.msk [vmem:[%s3380_s6] sm:$0xff] %vm2798_vm6, %v2797_v28 }

</bundles_post_ra>
